<compile_context>
chip_gen: v7x
topology: tpu7x:2x2x1
jax: 0.10.0
libtpu: 0.0.40
codegen_flags: <defaults>
</compile_context>

<pallas_src>
import functools

import jax
import jax.numpy as jnp
from jax import lax
from jax.experimental import pallas as pl
from jax.experimental.pallas import tpu as pltpu

NAVEC_EMB_SIZE = 300
NAVEC_PAD = 384          # 3 * 128: lane-aligned navec width
NEG_SLOPE = 0.1


def _leaky_relu(x):
    return jnp.where(x > 0, x, NEG_SLOPE * x)


def _round_up(x, m):
    return ((x + m - 1) // m) * m


def _reorder_pad_gates(w, hsz, hp):
    """[..., 4*hsz] in PyTorch gate order (i,f,g,o) -> (i,f,o,g), each gate padded to hp lanes."""
    gi, gf, gg, go = (w[..., k * hsz:(k + 1) * hsz] for k in range(4))
    pad = [(0, 0)] * (w.ndim - 1) + [(0, hp - hsz)]
    return jnp.concatenate([jnp.pad(x, pad) for x in (gi, gf, go, gg)], axis=-1)


# ------------------------------------------------------------------
# Fused kernel: embedding projection + hoisted input projection +
# LSTM recurrence + tail (Linear->LeakyReLU->Linear->Softmax)
# ------------------------------------------------------------------
def _punct_kernel(emb_rows_ref, w_emb_ref, b_emb_ref,
                  feats_ref, w_ih_f_ref, w_ih_e_ref, b_lstm_ref, w_hh_ref,
                  w1_ref, b1_ref, w2_ref, b2_ref,
                  out_ref, gx_scr, *, seq_unroll):
    s, bn, fsz = feats_ref.shape
    hp = w_hh_ref.shape[0]
    mm_dt = w_hh_ref.dtype            # bf16 (prod) or f32 (exact-check path)

    # --- navec embedding projection: Linear(300->E) + LeakyReLU(0.1) ---
    emb = _leaky_relu(
        jnp.dot(emb_rows_ref[...], w_emb_ref[...],
                preferred_element_type=jnp.float32) + b_emb_ref[...])        # [bn, E] f32

    # Per-word constant gate pre-activation (embedding is broadcast over S in
    # the original module) + combined LSTM biases.
    gate_const = (jnp.dot(emb.astype(mm_dt), w_ih_e_ref[...],
                          preferred_element_type=jnp.float32)
                  + b_lstm_ref[...])                                          # [bn, 4Hp] f32

    # --- hoisted input projection: ONE [S*bn, F] x [F, 4Hp] matmul; fold the
    #     per-word constant here (VALU has slack under the MXU) so the serial
    #     recurrence only does gx[t] + h @ W_hh. ---
    feats2d = feats_ref[...].reshape(s * bn, fsz)     # bn % 16 == 0 -> layout no-op
    gx = jnp.dot(feats2d, w_ih_f_ref[...], preferred_element_type=jnp.float32)
    gx_scr[...] = gx.reshape(s, bn, 4 * hp) + gate_const[None]

    # --- sequential recurrence: only h @ W_hh remains on the critical path ---
    h0 = jnp.zeros((bn, hp), jnp.float32)
    c0 = jnp.zeros((bn, hp), jnp.float32)

    def step(t, carry):
        h, c = carry
        gates = gx_scr[t] + jnp.dot(h.astype(mm_dt), w_hh_ref[...],
                                    preferred_element_type=jnp.float32)       # [bn, 4Hp]
        # gate order (reordered in wrapper): i, f, o, g
        # -> sigmoid only on the first 3Hp lanes, tanh only on the last Hp.
        sg = jax.nn.sigmoid(gates[:, :3 * hp])
        i = sg[:, 0 * hp:1 * hp]
        f = sg[:, 1 * hp:2 * hp]
        o = sg[:, 2 * hp:3 * hp]
        g = jnp.tanh(gates[:, 3 * hp:])
        c = f * c + i * g
        h = o * jnp.tanh(c)
        return (h, c)

    h, _ = lax.fori_loop(0, s, step, (h0, c0), unroll=seq_unroll)

    # --- tail: Linear -> LeakyReLU(0.1) -> Linear -> Softmax (lane-dense) ---
    z = _leaky_relu(jnp.dot(h.astype(mm_dt), w1_ref[...],
                            preferred_element_type=jnp.float32) + b1_ref[...])
    logits = (jnp.dot(z.astype(mm_dt), w2_ref[...],
                      preferred_element_type=jnp.float32) + b2_ref[...])      # [bn, OUT_PAD]
    m = jnp.max(logits, axis=-1, keepdims=True)
    e = jnp.exp(logits - m)             # padded class lanes have bias -1e30 -> exp == 0
    out_ref[...] = e * pl.reciprocal(jnp.sum(e, axis=-1, keepdims=True),
                                     approx=False)


# ------------------------------------------------------------------
# Wrapper
# ------------------------------------------------------------------
def punct_forward(params, features, navec_ids, *, use_bf16=True, block_n=None):
    s, n, fsz = features.shape
    esz = params["w_emb"].shape[1]
    hsz = params["w_hh"].shape[0]
    osz = params["w2"].shape[1]
    hp = _round_up(hsz, 128)            # lane-aligned hidden size (exact zero padding)
    out_pad = _round_up(osz, 128)       # lane-dense output slab
    mm_dt = jnp.bfloat16 if use_bf16 else jnp.float32
    lhs_bytes = 2 if use_bf16 else 4

    # navec id -> row gather stays in XLA (data-dependent row gather); pad 300->384.
    emb_rows = params["navec_table"][navec_ids].astype(jnp.float32)           # [N, 300]
    emb_rows = jnp.pad(emb_rows, ((0, 0), (0, NAVEC_PAD - NAVEC_EMB_SIZE)))
    w_emb = jnp.pad(params["w_emb"], ((0, NAVEC_PAD - NAVEC_EMB_SIZE), (0, 0)))

    # Split W_ih by the concat order of the original module: [features, emb];
    # reorder gate columns to (i, f, o, g) and pad each gate block to hp lanes.
    w_ih_f = _reorder_pad_gates(params["w_ih"][:fsz], hsz, hp)                # [F, 4Hp]
    w_ih_e = _reorder_pad_gates(params["w_ih"][fsz:], hsz, hp)                # [E, 4Hp]
    b_lstm = _reorder_pad_gates(params["b_lstm"], hsz, hp)                    # [1, 4Hp]
    w_hh = jnp.pad(_reorder_pad_gates(params["w_hh"], hsz, hp),
                   ((0, hp - hsz), (0, 0)))                                   # [Hp, 4Hp]

    # Tail weights padded so h/z padding lanes stay exactly zero; classifier
    # padding lanes get -1e30 bias so softmax over the 128-wide slab is exact.
    w1 = jnp.zeros((hp, hp), jnp.float32).at[:hsz, :hsz].set(params["w1"])
    b1 = jnp.zeros((1, hp), jnp.float32).at[:, :hsz].set(params["b1"])
    w2 = jnp.zeros((hp, out_pad), jnp.float32).at[:hsz, :osz].set(params["w2"])
    b2 = jnp.full((1, out_pad), -1e30, jnp.float32).at[:, :osz].set(params["b2"])

    # --- VMEM budget -> word-tile size (block_n, multiple of 16 for bf16) ---
    weight_bytes = ((NAVEC_PAD * esz + fsz * 4 * hp + esz * 4 * hp
                     + hp * 4 * hp + hp * hp + hp * out_pad) * lhs_bytes
                    + (esz + 4 * hp + hp + out_pad) * 4)

    def tile_bytes(bn):
        return (s * bn * 4 * hp * 4                 # gx scratch (single buffer, f32)
                + 2 * s * bn * fsz * lhs_bytes      # features (double-buffered)
                + 2 * bn * NAVEC_PAD * lhs_bytes    # emb rows (double-buffered)
                + 2 * bn * out_pad * 4              # output (double-buffered)
                + 2 * weight_bytes)                 # broadcast blocks (still 2-buffered)

    if block_n is None:
        budget = 40 << 20                           # conservative across v5e/v6e/v7x
        cap = max(16, _round_up(n, 16))
        block_n = 16
        while (block_n + 16 <= cap and block_n + 16 <= 512
               and tile_bytes(block_n + 16) <= budget):
            block_n += 16
        # v7x megacore: keep >= 2 grid tiles so both TensorCores get work.
        if n > 16:
            block_n = min(block_n, max(16, _round_up((n + 1) // 2, 16)))

    n_pad = _round_up(n, block_n)
    if n_pad != n:
        emb_rows = jnp.pad(emb_rows, ((0, n_pad - n), (0, 0)))
        features = jnp.pad(features, ((0, 0), (0, n_pad - n), (0, 0)))

    vmem_limit = int(min(56 << 20,
                         max(32 << 20, int(tile_bytes(block_n) * 1.4) + (2 << 20))))

    bc = lambda i: (0, 0)               # broadcast (weight) blocks
    kernel = functools.partial(_punct_kernel,
                               seq_unroll=True if s <= 16 else 4)

    out = pl.pallas_call(
        kernel,
        out_shape=jax.ShapeDtypeStruct((n_pad, out_pad), jnp.float32),
        grid=(n_pad // block_n,),
        in_specs=[
            pl.BlockSpec((block_n, NAVEC_PAD), lambda i: (i, 0)),             # emb rows
            pl.BlockSpec((NAVEC_PAD, esz), bc),                               # w_emb
            pl.BlockSpec((1, esz), bc),                                       # b_emb
            pl.BlockSpec((s, block_n, fsz), lambda i: (0, i, 0)),             # features
            pl.BlockSpec((fsz, 4 * hp), bc),                                  # W_ih (features)
            pl.BlockSpec((esz, 4 * hp), bc),                                  # W_ih (embedding)
            pl.BlockSpec((1, 4 * hp), bc),                                    # b_ih + b_hh
            pl.BlockSpec((hp, 4 * hp), bc),                                   # W_hh
            pl.BlockSpec((hp, hp), bc),                                       # w1
            pl.BlockSpec((1, hp), bc),                                        # b1
            pl.BlockSpec((hp, out_pad), bc),                                  # w2 (padded)
            pl.BlockSpec((1, out_pad), bc),                                   # b2 (padded)
        ],
        out_specs=pl.BlockSpec((block_n, out_pad), lambda i: (i, 0)),
        scratch_shapes=[pltpu.VMEM((s, block_n, 4 * hp), jnp.float32)],       # hoisted gates_x
        compiler_params=pltpu.CompilerParams(
            dimension_semantics=("parallel",),
            vmem_limit_bytes=vmem_limit),
    )(emb_rows.astype(mm_dt), w_emb.astype(mm_dt), params["b_emb"],
      features.astype(mm_dt), w_ih_f.astype(mm_dt), w_ih_e.astype(mm_dt), b_lstm,
      w_hh.astype(mm_dt), w1.astype(mm_dt), b1, w2.astype(mm_dt), b2)

    return out[:n, :osz]


# ------------------------------------------------------------------
# Parameters + pure-JAX reference
# ------------------------------------------------------------------
def init_params(key, vocab, embedding_size, features_size, hidden_size, out_size):
    d = embedding_size + features_size
    ks = jax.random.split(key, 10)

    def u(k, shape, scale=0.2):
        return scale * jax.random.uniform(k, shape, jnp.float32, -1.0, 1.0)

    return dict(
        navec_table=u(ks[0], (vocab, NAVEC_EMB_SIZE), 1.0),
        w_emb=u(ks[1], (NAVEC_EMB_SIZE, embedding_size)),   # stored as [in, out]
        b_emb=u(ks[2], (1, embedding_size)),
        w_ih=u(ks[3], (d, 4 * hidden_size)),                # PyTorch gate order i,f,g,o
        w_hh=u(ks[4], (hidden_size, 4 * hidden_size)),
        b_lstm=u(ks[5], (1, 4 * hidden_size)),              # b_ih + b_hh combined
        w1=u(ks[6], (hidden_size, hidden_size)),
        b1=u(ks[7], (1, hidden_size)),
        w2=u(ks[8], (hidden_size, out_size)),
        b2=u(ks[9], (1, out_size)),
    )


def reference(params, features, navec_ids):
    emb_rows = params["navec_table"][navec_ids]
    emb = jax.nn.leaky_relu(emb_rows @ params["w_emb"] + params["b_emb"], NEG_SLOPE)
    s, n, _ = features.shape
    x = jnp.concatenate(
        [features, jnp.broadcast_to(emb[None], (s,) + emb.shape)], axis=2)
    hsz = params["w_hh"].shape[0]

    def step(carry, x_t):
        h, c = carry
        gates = x_t @ params["w_ih"] + h @ params["w_hh"] + params["b_lstm"]
        i = jax.nn.sigmoid(gates[:, :hsz])
        f = jax.nn.sigmoid(gates[:, hsz:2 * hsz])
        g = jnp.tanh(gates[:, 2 * hsz:3 * hsz])
        o = jax.nn.sigmoid(gates[:, 3 * hsz:])
        c = f * c + i * g
        h = o * jnp.tanh(c)
        return (h, c), None

    init = (jnp.zeros((n, hsz), jnp.float32), jnp.zeros((n, hsz), jnp.float32))
    (h, _), _ = lax.scan(step, init, x)
    z = jax.nn.leaky_relu(h @ params["w1"] + params["b1"], NEG_SLOPE)
    logits = z @ params["w2"] + params["b2"]
    return jax.nn.softmax(logits, axis=1)


if __name__ == "__main__":
    EMB, FEAT, HID, OUT = 16, 16, 32, 4      # embedding/features/hidden/out sizes
    S, N, VOCAB = 8, 8, 64                   # context length, n words, toy vocab

    key = jax.random.PRNGKey(0)
    kp, kf, ki = jax.random.split(key, 3)
    params = init_params(kp, VOCAB, EMB, FEAT, HID, OUT)
    features = jax.random.normal(kf, (S, N, FEAT), jnp.float32)
    navec_ids = jax.random.randint(ki, (N,), 0, VOCAB, jnp.int32)

    ref = reference(params, features, navec_ids)

    # f32 MXU path: tight check of fusion / gate-reorder / padding logic.
    out_f32 = jax.block_until_ready(
        punct_forward(params, features, navec_ids, use_bf16=False))
    assert out_f32.shape == (N, OUT)
    assert jnp.allclose(out_f32, ref, atol=2e-3, rtol=2e-3), "f32 kernel/reference mismatch"
    assert jnp.allclose(out_f32.sum(-1), 1.0, atol=1e-4), "softmax rows should sum to 1"

    # bf16 MXU path (production default): looser tolerance for bf16 operands.
    out_bf16 = jax.block_until_ready(
        punct_forward(params, features, navec_ids, use_bf16=True))
    assert out_bf16.shape == (N, OUT)
    assert jnp.allclose(out_bf16, ref, atol=3e-2, rtol=3e-2), "bf16 kernel/reference mismatch"
    assert jnp.allclose(out_bf16.sum(-1), 1.0, atol=1e-4), "softmax rows should sum to 1"

    print("KERNEL_OK")
</pallas_src>

<mosaic_0001>
module attributes {stable_mosaic.version = 11 : i64} {
  func.func @_punct_kernel(%arg0: i32, %arg1: memref<16x384xf32, #tpu.memory_space<vmem>>, %arg2: memref<384x16xf32, #tpu.memory_space<vmem>>, %arg3: memref<1x16xf32, #tpu.memory_space<vmem>>, %arg4: memref<8x16x16xf32, #tpu.memory_space<vmem>>, %arg5: memref<16x512xf32, #tpu.memory_space<vmem>>, %arg6: memref<16x512xf32, #tpu.memory_space<vmem>>, %arg7: memref<1x512xf32, #tpu.memory_space<vmem>>, %arg8: memref<128x512xf32, #tpu.memory_space<vmem>>, %arg9: memref<128x128xf32, #tpu.memory_space<vmem>>, %arg10: memref<1x128xf32, #tpu.memory_space<vmem>>, %arg11: memref<128x128xf32, #tpu.memory_space<vmem>>, %arg12: memref<1x128xf32, #tpu.memory_space<vmem>>, %arg13: memref<16x128xf32, #tpu.memory_space<vmem>>, %arg14: memref<8x16x512xf32, #tpu.memory_space<vmem>>) attributes {dimension_semantics = [#tpu.dimension_semantics<parallel>], iteration_bounds = array<i64: 1>, scalar_prefetch = 0 : i64, scratch_operands = 1 : i64, tpu.core_type = #tpu.core_type<tc>, window_params = [{transform_indices = @transform_0, window_bounds = array<i64: 16, 384>}, {pipeline_mode = #tpu.pipeline_mode<synchronous>, transform_indices = @transform_1, window_bounds = array<i64: 384, 16>}, {pipeline_mode = #tpu.pipeline_mode<synchronous>, transform_indices = @transform_2, window_bounds = array<i64: 1, 16>}, {transform_indices = @transform_3, window_bounds = array<i64: 8, 16, 16>}, {pipeline_mode = #tpu.pipeline_mode<synchronous>, transform_indices = @transform_4, window_bounds = array<i64: 16, 512>}, {pipeline_mode = #tpu.pipeline_mode<synchronous>, transform_indices = @transform_5, window_bounds = array<i64: 16, 512>}, {pipeline_mode = #tpu.pipeline_mode<synchronous>, transform_indices = @transform_6, window_bounds = array<i64: 1, 512>}, {pipeline_mode = #tpu.pipeline_mode<synchronous>, transform_indices = @transform_7, window_bounds = array<i64: 128, 512>}, {pipeline_mode = #tpu.pipeline_mode<synchronous>, transform_indices = @transform_8, window_bounds = array<i64: 128, 128>}, {pipeline_mode = #tpu.pipeline_mode<synchronous>, transform_indices = @transform_9, window_bounds = array<i64: 1, 128>}, {pipeline_mode = #tpu.pipeline_mode<synchronous>, transform_indices = @transform_10, window_bounds = array<i64: 128, 128>}, {pipeline_mode = #tpu.pipeline_mode<synchronous>, transform_indices = @transform_11, window_bounds = array<i64: 1, 128>}, {transform_indices = @transform_12, window_bounds = array<i64: 16, 128>}]} {
    %c0 = arith.constant 0 : index
    %c0_0 = arith.constant 0 : index
    %0 = vector.load %arg1[%c0, %c0_0] : memref<16x384xf32, #tpu.memory_space<vmem>>, vector<16x384xf32>
    %c0_1 = arith.constant 0 : index
    %c0_2 = arith.constant 0 : index
    %1 = vector.load %arg2[%c0_1, %c0_2] : memref<384x16xf32, #tpu.memory_space<vmem>>, vector<384x16xf32>
    %cst = arith.constant dense<0.000000e+00> : vector<16x16xf32>
    %2 = tpu.matmul %0, %1, %cst {dimension_numbers = #tpu.dot_dimension_numbers<[1], [0], [0], [1], [0, 0, 1, 1], [], []>} : vector<16x384xf32>, vector<384x16xf32>, vector<16x16xf32> -> vector<16x16xf32>
    %c0_3 = arith.constant 0 : index
    %c0_4 = arith.constant 0 : index
    %3 = vector.load %arg3[%c0_3, %c0_4] : memref<1x16xf32, #tpu.memory_space<vmem>>, vector<1x16xf32>
    %4 = vector.broadcast %3 : vector<1x16xf32> to vector<16x16xf32>
    %5 = arith.addf %2, %4 : vector<16x16xf32>
    %cst_5 = arith.constant 0.000000e+00 : f32
    %6 = vector.broadcast %cst_5 : f32 to vector<16x16xf32>
    %7 = arith.cmpf ogt, %5, %6 : vector<16x16xf32>
    %cst_6 = arith.constant 1.000000e-01 : f32
    %8 = vector.broadcast %cst_6 : f32 to vector<16x16xf32>
    %9 = arith.mulf %8, %5 : vector<16x16xf32>
    %10 = arith.select %7, %5, %9 : vector<16x16xi1>, vector<16x16xf32>
    %c0_7 = arith.constant 0 : index
    %c0_8 = arith.constant 0 : index
    %11 = vector.load %arg6[%c0_7, %c0_8] : memref<16x512xf32, #tpu.memory_space<vmem>>, vector<16x512xf32>
    %cst_9 = arith.constant dense<0.000000e+00> : vector<16x512xf32>
    %12 = tpu.matmul %10, %11, %cst_9 {dimension_numbers = #tpu.dot_dimension_numbers<[1], [0], [0], [1], [0, 0, 1, 1], [], []>} : vector<16x16xf32>, vector<16x512xf32>, vector<16x512xf32> -> vector<16x512xf32>
    %c0_10 = arith.constant 0 : index
    %c0_11 = arith.constant 0 : index
    %13 = vector.load %arg7[%c0_10, %c0_11] : memref<1x512xf32, #tpu.memory_space<vmem>>, vector<1x512xf32>
    %14 = vector.broadcast %13 : vector<1x512xf32> to vector<16x512xf32>
    %15 = arith.addf %12, %14 : vector<16x512xf32>
    %c0_12 = arith.constant 0 : index
    %c0_13 = arith.constant 0 : index
    %c0_14 = arith.constant 0 : index
    %16 = vector.load %arg4[%c0_12, %c0_13, %c0_14] : memref<8x16x16xf32, #tpu.memory_space<vmem>>, vector<8x16x16xf32>
    %17 = vector.shape_cast %16 : vector<8x16x16xf32> to vector<128x16xf32>
    %c0_15 = arith.constant 0 : index
    %c0_16 = arith.constant 0 : index
    %18 = vector.load %arg5[%c0_15, %c0_16] : memref<16x512xf32, #tpu.memory_space<vmem>>, vector<16x512xf32>
    %cst_17 = arith.constant dense<0.000000e+00> : vector<128x512xf32>
    %19 = tpu.matmul %17, %18, %cst_17 {dimension_numbers = #tpu.dot_dimension_numbers<[1], [0], [0], [1], [0, 0, 1, 1], [], []>} : vector<128x16xf32>, vector<16x512xf32>, vector<128x512xf32> -> vector<128x512xf32>
    %20 = vector.shape_cast %19 : vector<128x512xf32> to vector<8x16x512xf32>
    %21 = vector.shape_cast %15 : vector<16x512xf32> to vector<1x16x512xf32>
    %22 = vector.broadcast %21 : vector<1x16x512xf32> to vector<8x16x512xf32>
    %23 = arith.addf %20, %22 : vector<8x16x512xf32>
    %c0_18 = arith.constant 0 : index
    %c0_19 = arith.constant 0 : index
    %c0_20 = arith.constant 0 : index
    %24 = vector.load %arg14[%c0_18, %c0_19, %c0_20] : memref<8x16x512xf32, #tpu.memory_space<vmem>>, vector<8x16x512xf32>
    tpu.vector_store %arg14[%c0_18, %c0_19, %c0_20], %23 {strides = array<i32>} : memref<8x16x512xf32, #tpu.memory_space<vmem>>, vector<8x16x512xf32>,
    %cst_21 = arith.constant 0.000000e+00 : f32
    %25 = vector.broadcast %cst_21 : f32 to vector<16x128xf32>
    %cst_22 = arith.constant 0.000000e+00 : f32
    %26 = vector.broadcast %cst_22 : f32 to vector<16x128xf32>
    %c0_i32 = arith.constant 0 : i32
    %27 = arith.index_cast %c0_i32 : i32 to index
    %c0_23 = arith.constant 0 : index
    %c0_24 = arith.constant 0 : index
    %28 = vector.load %arg14[%27, %c0_23, %c0_24] : memref<8x16x512xf32, #tpu.memory_space<vmem>>, vector<1x16x512xf32>
    %29 = vector.shape_cast %28 : vector<1x16x512xf32> to vector<16x512xf32>
    %c0_25 = arith.constant 0 : index
    %c0_26 = arith.constant 0 : index
    %30 = vector.load %arg8[%c0_25, %c0_26] : memref<128x512xf32, #tpu.memory_space<vmem>>, vector<128x512xf32>
    %cst_27 = arith.constant dense<0.000000e+00> : vector<16x512xf32>
    %31 = tpu.matmul %25, %30, %cst_27 {dimension_numbers = #tpu.dot_dimension_numbers<[1], [0], [0], [1], [0, 0, 1, 1], [], []>} : vector<16x128xf32>, vector<128x512xf32>, vector<16x512xf32> -> vector<16x512xf32>
    %32 = arith.addf %29, %31 : vector<16x512xf32>
    %33 = vector.extract_strided_slice %32 {offsets = [0, 0], sizes = [16, 384], strides = [1, 1]} : vector<16x512xf32> to vector<16x384xf32>
    %34 = arith.negf %33 : vector<16x384xf32>
    %35 = math.exp %34 : vector<16x384xf32>
    %cst_28 = arith.constant 1.000000e+00 : f32
    %36 = vector.broadcast %cst_28 : f32 to vector<16x384xf32>
    %37 = arith.addf %36, %35 : vector<16x384xf32>
    %38 = arith.divf %36, %37 : vector<16x384xf32>
    %39 = vector.extract_strided_slice %38 {offsets = [0, 0], sizes = [16, 128], strides = [1, 1]} : vector<16x384xf32> to vector<16x128xf32>
    %40 = vector.extract_strided_slice %38 {offsets = [0, 128], sizes = [16, 128], strides = [1, 1]} : vector<16x384xf32> to vector<16x128xf32>
    %41 = vector.extract_strided_slice %38 {offsets = [0, 256], sizes = [16, 128], strides = [1, 1]} : vector<16x384xf32> to vector<16x128xf32>
    %42 = vector.extract_strided_slice %32 {offsets = [0, 384], sizes = [16, 128], strides = [1, 1]} : vector<16x512xf32> to vector<16x128xf32>
    %43 = math.tanh %42 : vector<16x128xf32>
    %44 = arith.mulf %40, %26 : vector<16x128xf32>
    %45 = arith.mulf %39, %43 : vector<16x128xf32>
    %46 = arith.addf %44, %45 : vector<16x128xf32>
    %47 = math.tanh %46 : vector<16x128xf32>
    %48 = arith.mulf %41, %47 : vector<16x128xf32>
    %c1_i32 = arith.constant 1 : i32
    %49 = arith.index_cast %c1_i32 : i32 to index
    %c0_29 = arith.constant 0 : index
    %c0_30 = arith.constant 0 : index
    %50 = vector.load %arg14[%49, %c0_29, %c0_30] : memref<8x16x512xf32, #tpu.memory_space<vmem>>, vector<1x16x512xf32>
    %51 = vector.shape_cast %50 : vector<1x16x512xf32> to vector<16x512xf32>
    %c0_31 = arith.constant 0 : index
    %c0_32 = arith.constant 0 : index
    %52 = vector.load %arg8[%c0_31, %c0_32] : memref<128x512xf32, #tpu.memory_space<vmem>>, vector<128x512xf32>
    %cst_33 = arith.constant dense<0.000000e+00> : vector<16x512xf32>
    %53 = tpu.matmul %48, %52, %cst_33 {dimension_numbers = #tpu.dot_dimension_numbers<[1], [0], [0], [1], [0, 0, 1, 1], [], []>} : vector<16x128xf32>, vector<128x512xf32>, vector<16x512xf32> -> vector<16x512xf32>
    %54 = arith.addf %51, %53 : vector<16x512xf32>
    %55 = vector.extract_strided_slice %54 {offsets = [0, 0], sizes = [16, 384], strides = [1, 1]} : vector<16x512xf32> to vector<16x384xf32>
    %56 = arith.negf %55 : vector<16x384xf32>
    %57 = math.exp %56 : vector<16x384xf32>
    %cst_34 = arith.constant 1.000000e+00 : f32
    %58 = vector.broadcast %cst_34 : f32 to vector<16x384xf32>
    %59 = arith.addf %58, %57 : vector<16x384xf32>
    %60 = arith.divf %58, %59 : vector<16x384xf32>
    %61 = vector.extract_strided_slice %60 {offsets = [0, 0], sizes = [16, 128], strides = [1, 1]} : vector<16x384xf32> to vector<16x128xf32>
    %62 = vector.extract_strided_slice %60 {offsets = [0, 128], sizes = [16, 128], strides = [1, 1]} : vector<16x384xf32> to vector<16x128xf32>
    %63 = vector.extract_strided_slice %60 {offsets = [0, 256], sizes = [16, 128], strides = [1, 1]} : vector<16x384xf32> to vector<16x128xf32>
    %64 = vector.extract_strided_slice %54 {offsets = [0, 384], sizes = [16, 128], strides = [1, 1]} : vector<16x512xf32> to vector<16x128xf32>
    %65 = math.tanh %64 : vector<16x128xf32>
    %66 = arith.mulf %62, %46 : vector<16x128xf32>
    %67 = arith.mulf %61, %65 : vector<16x128xf32>
    %68 = arith.addf %66, %67 : vector<16x128xf32>
    %69 = math.tanh %68 : vector<16x128xf32>
    %70 = arith.mulf %63, %69 : vector<16x128xf32>
    %c2_i32 = arith.constant 2 : i32
    %71 = arith.index_cast %c2_i32 : i32 to index
    %c0_35 = arith.constant 0 : index
    %c0_36 = arith.constant 0 : index
    %72 = vector.load %arg14[%71, %c0_35, %c0_36] : memref<8x16x512xf32, #tpu.memory_space<vmem>>, vector<1x16x512xf32>
    %73 = vector.shape_cast %72 : vector<1x16x512xf32> to vector<16x512xf32>
    %c0_37 = arith.constant 0 : index
    %c0_38 = arith.constant 0 : index
    %74 = vector.load %arg8[%c0_37, %c0_38] : memref<128x512xf32, #tpu.memory_space<vmem>>, vector<128x512xf32>
    %cst_39 = arith.constant dense<0.000000e+00> : vector<16x512xf32>
    %75 = tpu.matmul %70, %74, %cst_39 {dimension_numbers = #tpu.dot_dimension_numbers<[1], [0], [0], [1], [0, 0, 1, 1], [], []>} : vector<16x128xf32>, vector<128x512xf32>, vector<16x512xf32> -> vector<16x512xf32>
    %76 = arith.addf %73, %75 : vector<16x512xf32>
    %77 = vector.extract_strided_slice %76 {offsets = [0, 0], sizes = [16, 384], strides = [1, 1]} : vector<16x512xf32> to vector<16x384xf32>
    %78 = arith.negf %77 : vector<16x384xf32>
    %79 = math.exp %78 : vector<16x384xf32>
    %cst_40 = arith.constant 1.000000e+00 : f32
    %80 = vector.broadcast %cst_40 : f32 to vector<16x384xf32>
    %81 = arith.addf %80, %79 : vector<16x384xf32>
    %82 = arith.divf %80, %81 : vector<16x384xf32>
    %83 = vector.extract_strided_slice %82 {offsets = [0, 0], sizes = [16, 128], strides = [1, 1]} : vector<16x384xf32> to vector<16x128xf32>
    %84 = vector.extract_strided_slice %82 {offsets = [0, 128], sizes = [16, 128], strides = [1, 1]} : vector<16x384xf32> to vector<16x128xf32>
    %85 = vector.extract_strided_slice %82 {offsets = [0, 256], sizes = [16, 128], strides = [1, 1]} : vector<16x384xf32> to vector<16x128xf32>
    %86 = vector.extract_strided_slice %76 {offsets = [0, 384], sizes = [16, 128], strides = [1, 1]} : vector<16x512xf32> to vector<16x128xf32>
    %87 = math.tanh %86 : vector<16x128xf32>
    %88 = arith.mulf %84, %68 : vector<16x128xf32>
    %89 = arith.mulf %83, %87 : vector<16x128xf32>
    %90 = arith.addf %88, %89 : vector<16x128xf32>
    %91 = math.tanh %90 : vector<16x128xf32>
    %92 = arith.mulf %85, %91 : vector<16x128xf32>
    %c3_i32 = arith.constant 3 : i32
    %93 = arith.index_cast %c3_i32 : i32 to index
    %c0_41 = arith.constant 0 : index
    %c0_42 = arith.constant 0 : index
    %94 = vector.load %arg14[%93, %c0_41, %c0_42] : memref<8x16x512xf32, #tpu.memory_space<vmem>>, vector<1x16x512xf32>
    %95 = vector.shape_cast %94 : vector<1x16x512xf32> to vector<16x512xf32>
    %c0_43 = arith.constant 0 : index
    %c0_44 = arith.constant 0 : index
    %96 = vector.load %arg8[%c0_43, %c0_44] : memref<128x512xf32, #tpu.memory_space<vmem>>, vector<128x512xf32>
    %cst_45 = arith.constant dense<0.000000e+00> : vector<16x512xf32>
    %97 = tpu.matmul %92, %96, %cst_45 {dimension_numbers = #tpu.dot_dimension_numbers<[1], [0], [0], [1], [0, 0, 1, 1], [], []>} : vector<16x128xf32>, vector<128x512xf32>, vector<16x512xf32> -> vector<16x512xf32>
    %98 = arith.addf %95, %97 : vector<16x512xf32>
    %99 = vector.extract_strided_slice %98 {offsets = [0, 0], sizes = [16, 384], strides = [1, 1]} : vector<16x512xf32> to vector<16x384xf32>
    %100 = arith.negf %99 : vector<16x384xf32>
    %101 = math.exp %100 : vector<16x384xf32>
    %cst_46 = arith.constant 1.000000e+00 : f32
    %102 = vector.broadcast %cst_46 : f32 to vector<16x384xf32>
    %103 = arith.addf %102, %101 : vector<16x384xf32>
    %104 = arith.divf %102, %103 : vector<16x384xf32>
    %105 = vector.extract_strided_slice %104 {offsets = [0, 0], sizes = [16, 128], strides = [1, 1]} : vector<16x384xf32> to vector<16x128xf32>
    %106 = vector.extract_strided_slice %104 {offsets = [0, 128], sizes = [16, 128], strides = [1, 1]} : vector<16x384xf32> to vector<16x128xf32>
    %107 = vector.extract_strided_slice %104 {offsets = [0, 256], sizes = [16, 128], strides = [1, 1]} : vector<16x384xf32> to vector<16x128xf32>
    %108 = vector.extract_strided_slice %98 {offsets = [0, 384], sizes = [16, 128], strides = [1, 1]} : vector<16x512xf32> to vector<16x128xf32>
    %109 = math.tanh %108 : vector<16x128xf32>
    %110 = arith.mulf %106, %90 : vector<16x128xf32>
    %111 = arith.mulf %105, %109 : vector<16x128xf32>
    %112 = arith.addf %110, %111 : vector<16x128xf32>
    %113 = math.tanh %112 : vector<16x128xf32>
    %114 = arith.mulf %107, %113 : vector<16x128xf32>
    %c4_i32 = arith.constant 4 : i32
    %115 = arith.index_cast %c4_i32 : i32 to index
    %c0_47 = arith.constant 0 : index
    %c0_48 = arith.constant 0 : index
    %116 = vector.load %arg14[%115, %c0_47, %c0_48] : memref<8x16x512xf32, #tpu.memory_space<vmem>>, vector<1x16x512xf32>
    %117 = vector.shape_cast %116 : vector<1x16x512xf32> to vector<16x512xf32>
    %c0_49 = arith.constant 0 : index
    %c0_50 = arith.constant 0 : index
    %118 = vector.load %arg8[%c0_49, %c0_50] : memref<128x512xf32, #tpu.memory_space<vmem>>, vector<128x512xf32>
    %cst_51 = arith.constant dense<0.000000e+00> : vector<16x512xf32>
    %119 = tpu.matmul %114, %118, %cst_51 {dimension_numbers = #tpu.dot_dimension_numbers<[1], [0], [0], [1], [0, 0, 1, 1], [], []>} : vector<16x128xf32>, vector<128x512xf32>, vector<16x512xf32> -> vector<16x512xf32>
    %120 = arith.addf %117, %119 : vector<16x512xf32>
    %121 = vector.extract_strided_slice %120 {offsets = [0, 0], sizes = [16, 384], strides = [1, 1]} : vector<16x512xf32> to vector<16x384xf32>
    %122 = arith.negf %121 : vector<16x384xf32>
    %123 = math.exp %122 : vector<16x384xf32>
    %cst_52 = arith.constant 1.000000e+00 : f32
    %124 = vector.broadcast %cst_52 : f32 to vector<16x384xf32>
    %125 = arith.addf %124, %123 : vector<16x384xf32>
    %126 = arith.divf %124, %125 : vector<16x384xf32>
    %127 = vector.extract_strided_slice %126 {offsets = [0, 0], sizes = [16, 128], strides = [1, 1]} : vector<16x384xf32> to vector<16x128xf32>
    %128 = vector.extract_strided_slice %126 {offsets = [0, 128], sizes = [16, 128], strides = [1, 1]} : vector<16x384xf32> to vector<16x128xf32>
    %129 = vector.extract_strided_slice %126 {offsets = [0, 256], sizes = [16, 128], strides = [1, 1]} : vector<16x384xf32> to vector<16x128xf32>
    %130 = vector.extract_strided_slice %120 {offsets = [0, 384], sizes = [16, 128], strides = [1, 1]} : vector<16x512xf32> to vector<16x128xf32>
    %131 = math.tanh %130 : vector<16x128xf32>
    %132 = arith.mulf %128, %112 : vector<16x128xf32>
    %133 = arith.mulf %127, %131 : vector<16x128xf32>
    %134 = arith.addf %132, %133 : vector<16x128xf32>
    %135 = math.tanh %134 : vector<16x128xf32>
    %136 = arith.mulf %129, %135 : vector<16x128xf32>
    %c5_i32 = arith.constant 5 : i32
    %137 = arith.index_cast %c5_i32 : i32 to index
    %c0_53 = arith.constant 0 : index
    %c0_54 = arith.constant 0 : index
    %138 = vector.load %arg14[%137, %c0_53, %c0_54] : memref<8x16x512xf32, #tpu.memory_space<vmem>>, vector<1x16x512xf32>
    %139 = vector.shape_cast %138 : vector<1x16x512xf32> to vector<16x512xf32>
    %c0_55 = arith.constant 0 : index
    %c0_56 = arith.constant 0 : index
    %140 = vector.load %arg8[%c0_55, %c0_56] : memref<128x512xf32, #tpu.memory_space<vmem>>, vector<128x512xf32>
    %cst_57 = arith.constant dense<0.000000e+00> : vector<16x512xf32>
    %141 = tpu.matmul %136, %140, %cst_57 {dimension_numbers = #tpu.dot_dimension_numbers<[1], [0], [0], [1], [0, 0, 1, 1], [], []>} : vector<16x128xf32>, vector<128x512xf32>, vector<16x512xf32> -> vector<16x512xf32>
    %142 = arith.addf %139, %141 : vector<16x512xf32>
    %143 = vector.extract_strided_slice %142 {offsets = [0, 0], sizes = [16, 384], strides = [1, 1]} : vector<16x512xf32> to vector<16x384xf32>
    %144 = arith.negf %143 : vector<16x384xf32>
    %145 = math.exp %144 : vector<16x384xf32>
    %cst_58 = arith.constant 1.000000e+00 : f32
    %146 = vector.broadcast %cst_58 : f32 to vector<16x384xf32>
    %147 = arith.addf %146, %145 : vector<16x384xf32>
    %148 = arith.divf %146, %147 : vector<16x384xf32>
    %149 = vector.extract_strided_slice %148 {offsets = [0, 0], sizes = [16, 128], strides = [1, 1]} : vector<16x384xf32> to vector<16x128xf32>
    %150 = vector.extract_strided_slice %148 {offsets = [0, 128], sizes = [16, 128], strides = [1, 1]} : vector<16x384xf32> to vector<16x128xf32>
    %151 = vector.extract_strided_slice %148 {offsets = [0, 256], sizes = [16, 128], strides = [1, 1]} : vector<16x384xf32> to vector<16x128xf32>
    %152 = vector.extract_strided_slice %142 {offsets = [0, 384], sizes = [16, 128], strides = [1, 1]} : vector<16x512xf32> to vector<16x128xf32>
    %153 = math.tanh %152 : vector<16x128xf32>
    %154 = arith.mulf %150, %134 : vector<16x128xf32>
    %155 = arith.mulf %149, %153 : vector<16x128xf32>
    %156 = arith.addf %154, %155 : vector<16x128xf32>
    %157 = math.tanh %156 : vector<16x128xf32>
    %158 = arith.mulf %151, %157 : vector<16x128xf32>
    %c6_i32 = arith.constant 6 : i32
    %159 = arith.index_cast %c6_i32 : i32 to index
    %c0_59 = arith.constant 0 : index
    %c0_60 = arith.constant 0 : index
    %160 = vector.load %arg14[%159, %c0_59, %c0_60] : memref<8x16x512xf32, #tpu.memory_space<vmem>>, vector<1x16x512xf32>
    %161 = vector.shape_cast %160 : vector<1x16x512xf32> to vector<16x512xf32>
    %c0_61 = arith.constant 0 : index
    %c0_62 = arith.constant 0 : index
    %162 = vector.load %arg8[%c0_61, %c0_62] : memref<128x512xf32, #tpu.memory_space<vmem>>, vector<128x512xf32>
    %cst_63 = arith.constant dense<0.000000e+00> : vector<16x512xf32>
    %163 = tpu.matmul %158, %162, %cst_63 {dimension_numbers = #tpu.dot_dimension_numbers<[1], [0], [0], [1], [0, 0, 1, 1], [], []>} : vector<16x128xf32>, vector<128x512xf32>, vector<16x512xf32> -> vector<16x512xf32>
    %164 = arith.addf %161, %163 : vector<16x512xf32>
    %165 = vector.extract_strided_slice %164 {offsets = [0, 0], sizes = [16, 384], strides = [1, 1]} : vector<16x512xf32> to vector<16x384xf32>
    %166 = arith.negf %165 : vector<16x384xf32>
    %167 = math.exp %166 : vector<16x384xf32>
    %cst_64 = arith.constant 1.000000e+00 : f32
    %168 = vector.broadcast %cst_64 : f32 to vector<16x384xf32>
    %169 = arith.addf %168, %167 : vector<16x384xf32>
    %170 = arith.divf %168, %169 : vector<16x384xf32>
    %171 = vector.extract_strided_slice %170 {offsets = [0, 0], sizes = [16, 128], strides = [1, 1]} : vector<16x384xf32> to vector<16x128xf32>
    %172 = vector.extract_strided_slice %170 {offsets = [0, 128], sizes = [16, 128], strides = [1, 1]} : vector<16x384xf32> to vector<16x128xf32>
    %173 = vector.extract_strided_slice %170 {offsets = [0, 256], sizes = [16, 128], strides = [1, 1]} : vector<16x384xf32> to vector<16x128xf32>
    %174 = vector.extract_strided_slice %164 {offsets = [0, 384], sizes = [16, 128], strides = [1, 1]} : vector<16x512xf32> to vector<16x128xf32>
    %175 = math.tanh %174 : vector<16x128xf32>
    %176 = arith.mulf %172, %156 : vector<16x128xf32>
    %177 = arith.mulf %171, %175 : vector<16x128xf32>
    %178 = arith.addf %176, %177 : vector<16x128xf32>
    %179 = math.tanh %178 : vector<16x128xf32>
    %180 = arith.mulf %173, %179 : vector<16x128xf32>
    %c7_i32 = arith.constant 7 : i32
    %181 = arith.index_cast %c7_i32 : i32 to index
    %c0_65 = arith.constant 0 : index
    %c0_66 = arith.constant 0 : index
    %182 = vector.load %arg14[%181, %c0_65, %c0_66] : memref<8x16x512xf32, #tpu.memory_space<vmem>>, vector<1x16x512xf32>
    %183 = vector.shape_cast %182 : vector<1x16x512xf32> to vector<16x512xf32>
    %c0_67 = arith.constant 0 : index
    %c0_68 = arith.constant 0 : index
    %184 = vector.load %arg8[%c0_67, %c0_68] : memref<128x512xf32, #tpu.memory_space<vmem>>, vector<128x512xf32>
    %cst_69 = arith.constant dense<0.000000e+00> : vector<16x512xf32>
    %185 = tpu.matmul %180, %184, %cst_69 {dimension_numbers = #tpu.dot_dimension_numbers<[1], [0], [0], [1], [0, 0, 1, 1], [], []>} : vector<16x128xf32>, vector<128x512xf32>, vector<16x512xf32> -> vector<16x512xf32>
    %186 = arith.addf %183, %185 : vector<16x512xf32>
    %187 = vector.extract_strided_slice %186 {offsets = [0, 0], sizes = [16, 384], strides = [1, 1]} : vector<16x512xf32> to vector<16x384xf32>
    %188 = arith.negf %187 : vector<16x384xf32>
    %189 = math.exp %188 : vector<16x384xf32>
    %cst_70 = arith.constant 1.000000e+00 : f32
    %190 = vector.broadcast %cst_70 : f32 to vector<16x384xf32>
    %191 = arith.addf %190, %189 : vector<16x384xf32>
    %192 = arith.divf %190, %191 : vector<16x384xf32>
    %193 = vector.extract_strided_slice %192 {offsets = [0, 0], sizes = [16, 128], strides = [1, 1]} : vector<16x384xf32> to vector<16x128xf32>
    %194 = vector.extract_strided_slice %192 {offsets = [0, 128], sizes = [16, 128], strides = [1, 1]} : vector<16x384xf32> to vector<16x128xf32>
    %195 = vector.extract_strided_slice %192 {offsets = [0, 256], sizes = [16, 128], strides = [1, 1]} : vector<16x384xf32> to vector<16x128xf32>
    %196 = vector.extract_strided_slice %186 {offsets = [0, 384], sizes = [16, 128], strides = [1, 1]} : vector<16x512xf32> to vector<16x128xf32>
    %197 = math.tanh %196 : vector<16x128xf32>
    %198 = arith.mulf %194, %178 : vector<16x128xf32>
    %199 = arith.mulf %193, %197 : vector<16x128xf32>
    %200 = arith.addf %198, %199 : vector<16x128xf32>
    %201 = math.tanh %200 : vector<16x128xf32>
    %202 = arith.mulf %195, %201 : vector<16x128xf32>
    %c8_i32 = arith.constant 8 : i32
    %c0_71 = arith.constant 0 : index
    %c0_72 = arith.constant 0 : index
    %203 = vector.load %arg9[%c0_71, %c0_72] : memref<128x128xf32, #tpu.memory_space<vmem>>, vector<128x128xf32>
    %cst_73 = arith.constant dense<0.000000e+00> : vector<16x128xf32>
    %204 = tpu.matmul %202, %203, %cst_73 {dimension_numbers = #tpu.dot_dimension_numbers<[1], [0], [0], [1], [0, 0, 1, 1], [], []>} : vector<16x128xf32>, vector<128x128xf32>, vector<16x128xf32> -> vector<16x128xf32>
    %c0_74 = arith.constant 0 : index
    %c0_75 = arith.constant 0 : index
    %205 = vector.load %arg10[%c0_74, %c0_75] : memref<1x128xf32, #tpu.memory_space<vmem>>, vector<1x128xf32>
    %206 = vector.broadcast %205 : vector<1x128xf32> to vector<16x128xf32>
    %207 = arith.addf %204, %206 : vector<16x128xf32>
    %cst_76 = arith.constant 0.000000e+00 : f32
    %208 = vector.broadcast %cst_76 : f32 to vector<16x128xf32>
    %209 = arith.cmpf ogt, %207, %208 : vector<16x128xf32>
    %cst_77 = arith.constant 1.000000e-01 : f32
    %210 = vector.broadcast %cst_77 : f32 to vector<16x128xf32>
    %211 = arith.mulf %210, %207 : vector<16x128xf32>
    %212 = arith.select %209, %207, %211 : vector<16x128xi1>, vector<16x128xf32>
    %c0_78 = arith.constant 0 : index
    %c0_79 = arith.constant 0 : index
    %213 = vector.load %arg11[%c0_78, %c0_79] : memref<128x128xf32, #tpu.memory_space<vmem>>, vector<128x128xf32>
    %cst_80 = arith.constant dense<0.000000e+00> : vector<16x128xf32>
    %214 = tpu.matmul %212, %213, %cst_80 {dimension_numbers = #tpu.dot_dimension_numbers<[1], [0], [0], [1], [0, 0, 1, 1], [], []>} : vector<16x128xf32>, vector<128x128xf32>, vector<16x128xf32> -> vector<16x128xf32>
    %c0_81 = arith.constant 0 : index
    %c0_82 = arith.constant 0 : index
    %215 = vector.load %arg12[%c0_81, %c0_82] : memref<1x128xf32, #tpu.memory_space<vmem>>, vector<1x128xf32>
    %216 = vector.broadcast %215 : vector<1x128xf32> to vector<16x128xf32>
    %217 = arith.addf %214, %216 : vector<16x128xf32>
    %cst_83 = arith.constant dense<0xFF800000> : vector<16xf32>
    %218 = vector.multi_reduction <maximumf>, %217, %cst_83 [1] : vector<16x128xf32> to vector<16xf32>
    %219 = vector.shape_cast %218 : vector<16xf32> to vector<16x1xf32>
    %220 = vector.broadcast %219 : vector<16x1xf32> to vector<16x128xf32>
    %221 = arith.subf %217, %220 : vector<16x128xf32>
    %222 = math.exp %221 : vector<16x128xf32>
    %cst_84 = arith.constant dense<0.000000e+00> : vector<16xf32>
    %223 = vector.multi_reduction <add>, %222, %cst_84 [1] : vector<16x128xf32> to vector<16xf32>
    %224 = vector.shape_cast %223 : vector<16xf32> to vector<16x1xf32>
    %225 = tpu.reciprocal %224 : vector<16x1xf32> -> vector<16x1xf32>
    %226 = vector.broadcast %225 : vector<16x1xf32> to vector<16x128xf32>
    %227 = arith.mulf %222, %226 : vector<16x128xf32>
    %c0_85 = arith.constant 0 : index
    %c0_86 = arith.constant 0 : index
    %228 = vector.load %arg13[%c0_85, %c0_86] : memref<16x128xf32, #tpu.memory_space<vmem>>, vector<16x128xf32>
    tpu.vector_store %arg13[%c0_85, %c0_86], %227 {strides = array<i32>} : memref<16x128xf32, #tpu.memory_space<vmem>>, vector<16x128xf32>,
    return
  }
  func.func @transform_0(%arg0: i32) -> (i32, i32) {
    %c0_i32 = arith.constant 0 : i32
    %c0_i32_0 = arith.constant 0 : i32
    return %arg0, %c0_i32 : i32, i32
  }
  func.func @transform_1(%arg0: i32) -> (i32, i32) {
    %c0_i32 = arith.constant 0 : i32
    %c0_i32_0 = arith.constant 0 : i32
    %c0_i32_1 = arith.constant 0 : i32
    return %c0_i32, %c0_i32_0 : i32, i32
  }
  func.func @transform_2(%arg0: i32) -> (i32, i32) {
    %c0_i32 = arith.constant 0 : i32
    %c0_i32_0 = arith.constant 0 : i32
    %c0_i32_1 = arith.constant 0 : i32
    return %c0_i32, %c0_i32_0 : i32, i32
  }
  func.func @transform_3(%arg0: i32) -> (i32, i32, i32) {
    %c0_i32 = arith.constant 0 : i32
    %c0_i32_0 = arith.constant 0 : i32
    %c0_i32_1 = arith.constant 0 : i32
    return %c0_i32, %arg0, %c0_i32_0 : i32, i32, i32
  }
  func.func @transform_4(%arg0: i32) -> (i32, i32) {
    %c0_i32 = arith.constant 0 : i32
    %c0_i32_0 = arith.constant 0 : i32
    %c0_i32_1 = arith.constant 0 : i32
    return %c0_i32, %c0_i32_0 : i32, i32
  }
  func.func @transform_5(%arg0: i32) -> (i32, i32) {
    %c0_i32 = arith.constant 0 : i32
    %c0_i32_0 = arith.constant 0 : i32
    %c0_i32_1 = arith.constant 0 : i32
    return %c0_i32, %c0_i32_0 : i32, i32
  }
  func.func @transform_6(%arg0: i32) -> (i32, i32) {
    %c0_i32 = arith.constant 0 : i32
    %c0_i32_0 = arith.constant 0 : i32
    %c0_i32_1 = arith.constant 0 : i32
    return %c0_i32, %c0_i32_0 : i32, i32
  }
  func.func @transform_7(%arg0: i32) -> (i32, i32) {
    %c0_i32 = arith.constant 0 : i32
    %c0_i32_0 = arith.constant 0 : i32
    %c0_i32_1 = arith.constant 0 : i32
    return %c0_i32, %c0_i32_0 : i32, i32
  }
  func.func @transform_8(%arg0: i32) -> (i32, i32) {
    %c0_i32 = arith.constant 0 : i32
    %c0_i32_0 = arith.constant 0 : i32
    %c0_i32_1 = arith.constant 0 : i32
    return %c0_i32, %c0_i32_0 : i32, i32
  }
  func.func @transform_9(%arg0: i32) -> (i32, i32) {
    %c0_i32 = arith.constant 0 : i32
    %c0_i32_0 = arith.constant 0 : i32
    %c0_i32_1 = arith.constant 0 : i32
    return %c0_i32, %c0_i32_0 : i32, i32
  }
  func.func @transform_10(%arg0: i32) -> (i32, i32) {
    %c0_i32 = arith.constant 0 : i32
    %c0_i32_0 = arith.constant 0 : i32
    %c0_i32_1 = arith.constant 0 : i32
    return %c0_i32, %c0_i32_0 : i32, i32
  }
  func.func @transform_11(%arg0: i32) -> (i32, i32) {
    %c0_i32 = arith.constant 0 : i32
    %c0_i32_0 = arith.constant 0 : i32
    %c0_i32_1 = arith.constant 0 : i32
    return %c0_i32, %c0_i32_0 : i32, i32
  }
  func.func @transform_12(%arg0: i32) -> (i32, i32) {
    %c0_i32 = arith.constant 0 : i32
    %c0_i32_0 = arith.constant 0 : i32
    return %arg0, %c0_i32 : i32, i32
  }
}

</mosaic_0001>

<bundles_post_ra>
// kernel: tpu_custom_call.1
= control target key start
LH: loop header
LB: loop body
LE: loop exit
PB: predicated region body
PF: predicated region fallthrough
CT: control target
= control target key end

     0   :  { %17 = vsyncpa [#allocation4], 0  ;;  %s5523_s0 = inlined_call_operand.vmem [shape: f32[16,384], index: 0, kind: input, shape index: {}]   ;;  %s5524_s1 = inlined_call_operand.vmem [shape: f32[384,16], index: 1, kind: input, shape index: {}]   ;;  %s5525_s2 = inlined_call_operand.vmem [shape: f32[1,16], index: 2, kind: input, shape index: {}]   ;;  %s5526_s3 = inlined_call_operand.vmem [shape: f32[8,16,16], index: 3, kind: input, shape index: {}]   ;;  %s5527_s4 = inlined_call_operand.hbm [shape: f32[16,512], index: 4, kind: input, shape index: {}]   ;;  %s5528_s5 = inlined_call_operand.hbm [shape: f32[16,512], index: 5, kind: input, shape index: {}]   ;;  %s5529_s6 = inlined_call_operand.vmem [shape: f32[1,512], index: 6, kind: input, shape index: {}]   ;;  %s5530_s7 = inlined_call_operand.hbm [shape: f32[128,512], index: 7, kind: input, shape index: {}]   ;;  %s5531_s8 = inlined_call_operand.vmem [shape: f32[128,128], index: 8, kind: input, shape index: {}]   ;;  %s5532_s9 = inlined_call_operand.vmem [shape: f32[1,128], index: 9, kind: input, shape index: {}]   ;;  %s5533_s10 = inlined_call_operand.vmem [shape: f32[128,128], index: 10, kind: input, shape index: {}]   ;;  %s5534_s11 = inlined_call_operand.vmem [shape: f32[1,128], index: 11, kind: input, shape index: {}]   ;;  %s5535_s12 = inlined_call_operand.hbm [shape: f32[16,128], index: 12, kind: output, shape index: {}]  }
   0x1   :  { %18 = vsyncpa [#allocation7], 0 }
   0x2   :  { %19 = vsyncpa [#allocation5], 0  ;;  %s4503_s21 = smov [#allocation6]   ;;  %s4504_s23 = smov [#allocation3]  }
   0x3   :  { %s45_s22 = sshll.u32 %s4503_s21, 4  ;;  %s33_s24 = sshll.u32 %s4504_s23, 4  ;;  %s46_s22 = int_to_ptr.vmem [resolvable:$true] %s45_s22  ;;  %s4577_s24 = int_to_ptr.vmem [resolvable:$true] %s33_s24 }
   0x4   :  { %s4409_s27 = scalar_lea.hbm %s5528_s5, 1024 }
   0x5   :  { %p4410_p0 = scmp.ne.s32.totalorder %s5528_s5, %s4409_s27  ;;  %p4413_p1 = scmp.lt.u32.totalorder %s4409_s27, %s5528_s5 }
   0x7   :  { %p4415_p2 = pnand %p4413_p1, %p4410_p0 }
   0x9   :  { %4418 = shalt.err (!%p4415_p2)
}
   0xa   :  { %s4419_s14 = scalar_lea.vmem %s46_s22, 1024  ;;  %p4424_p4 = scmp.lt.s32.totalorder %s46_s22, %s46_s22 }
   0xb   :  { %p4420_p3 = scmp.ne.s32.totalorder %s46_s22, %s4419_s14  ;;  %p4425_p5 = scmp.lt.s32.totalorder %s4419_s14, %s4419_s14 }
   0xd   :  { %p4426_p6 = por %p4425_p5, %p4424_p4 }
   0xf   :  { %p4427_p7 = pnand %p4426_p6, %p4420_p3 }
  0x11   :  { %4430 = shalt.err (!%p4427_p7)
}
  0x12   :  { %s4505_s15 = smov 512   ;;  %s4506_s16 = smov 32  }
  0x13   :  { %51 = dma.hbm_to_vmem [thread:$0]  %s5528_s5, 1024, %s46_s22, [#allocation7], %s4505_s15, %s4505_s15, %s4506_s16  }
  0x14   :  { %s4431_s21 = scalar_lea.hbm %s5527_s4, 1024 }
  0x15   :  { %p4432_p8 = scmp.ne.s32.totalorder %s5527_s4, %s4431_s21  ;;  %p4435_p9 = scmp.lt.u32.totalorder %s4431_s21, %s5527_s4 }
  0x17   :  { %p4437_p10 = pnand %p4435_p9, %p4432_p8 }
  0x19   :  { %4440 = shalt.err (!%p4437_p10)
}
  0x1a   :  { %s4441_s28 = scalar_lea.vmem %s4577_s24, 1024  ;;  %p4446_p12 = scmp.lt.s32.totalorder %s4577_s24, %s4577_s24 }
  0x1b   :  { %p4442_p11 = scmp.ne.s32.totalorder %s4577_s24, %s4441_s28  ;;  %p4447_p13 = scmp.lt.s32.totalorder %s4441_s28, %s4441_s28 }
  0x1d   :  { %p4448_p0 = por %p4447_p13, %p4446_p12 }
  0x1f   :  { %p4449_p1 = pnand %p4448_p0, %p4442_p11 }
  0x21   :  { %4452 = shalt.err (!%p4449_p1)
}
  0x22   :  { %39 = dma.hbm_to_vmem [thread:$0]  %s5527_s4, 1024, %s4577_s24, [#allocation4], %s4505_s15, %s4505_s15, %s4506_s16  }
  0x23   :  { %s4507_s29 = smov [#allocation8]   ;;  %s4453_s17 = scalar_lea.hbm %s5530_s7, 8192 }
  0x24   :  { %s59_s30 = sshll.u32 %s4507_s29, 4  ;;  %p4454_p2 = scmp.ne.s32.totalorder %s5530_s7, %s4453_s17  ;;  %s60_s30 = int_to_ptr.vmem [resolvable:$true] %s59_s30 }
  0x25   :  { %p4457_p3 = scmp.lt.u32.totalorder %s4453_s17, %s5530_s7 }
  0x27   :  { %p4459_p4 = pnand %p4457_p3, %p4454_p2 }
  0x29   :  { %4462 = shalt.err (!%p4459_p4)
}
  0x2a   :  { %s4463_s23 = scalar_lea.vmem %s60_s30, 8192  ;;  %p4468_p6 = scmp.lt.s32.totalorder %s60_s30, %s60_s30 }
  0x2b   :  { %p4464_p5 = scmp.ne.s32.totalorder %s60_s30, %s4463_s23  ;;  %p4469_p7 = scmp.lt.s32.totalorder %s4463_s23, %s4463_s23 }
  0x2d   :  { %p4470_p8 = por %p4469_p7, %p4468_p6 }
  0x2f   :  { %p4471_p9 = pnand %p4470_p8, %p4464_p5 }
  0x31   :  { %4474 = shalt.err (!%p4471_p9)
}
  0x32   :  { %65 = dma.hbm_to_vmem [thread:$0]  %s5530_s7, 8192, %s60_s30, [#allocation7], %s4505_s15, %s4505_s15, %s4506_s16  }
  0x33   :  { %4497 = dma.done.wait [#allocation4], 1024  }
  0x34   :  { %4498 = vsyncadd [#allocation4], 4294966272 }
  0x35   :  { %4499 = dma.done.wait [#allocation7], 9216  }
  0x36   :  { %4500 = vsyncadd [#allocation7], 4294958080  ;;  %v105_v0 = vld [vmem:[%s5524_s1 + $0x80] sm:$0xff]  ;;  %v106_v1 = vld [vmem:[%s5524_s1 + $0x88] sm:$0xff]  ;;  %vm330_vm0 = vcmask 130048  }
  0x37   :  { %v89_v2 = vld [vmem:[%s5524_s1] sm:$0xff]  ;;  %v3352_v3 = vpack.c.bf16 %v106_v1, %v105_v0  ;;  %v90_v4 = vld [vmem:[%s5524_s1 + $0x8] sm:$0xff]  ;;  %v107_v9 = vld [vmem:[%s5524_s1 + $0x90] sm:$0xff] }
  0x38   :  { %v121_v5 = vld [vmem:[%s5524_s1 + $0x100] sm:$0xff]  ;;  %v122_v6 = vld [vmem:[%s5524_s1 + $0x108] sm:$0xff]  ;;  %v3354_v7 = vpack.c.bf16 %v90_v4, %v89_v2  ;;  %v108_v10 = vld [vmem:[%s5524_s1 + $0x98] sm:$0xff] }
  0x39   :  { %v3384_v8 = vpack.c.bf16 %v122_v6, %v121_v5  ;;  %v91_v11 = vld [vmem:[%s5524_s1 + $0x10] sm:$0xff]  ;;  %3353 = vmatprep.subr.bf16.mxu0 %v3352_v3  ;;  %v3356_v12 = vpack.c.bf16 %v108_v10, %v107_v9  ;;  %v92_v13 = vld [vmem:[%s5524_s1 + $0x18] sm:$0xff]  ;;  %v109_v18 = vld [vmem:[%s5524_s1 + $0xa0] sm:$0xff] }
  0x3a   :  { %v123_v14 = vld [vmem:[%s5524_s1 + $0x110] sm:$0xff]  ;;  %v124_v15 = vld [vmem:[%s5524_s1 + $0x118] sm:$0xff]  ;;  %3355 = vmatpush3.bf16.msra.mxu0 %v3354_v7  ;;  %v3358_v16 = vpack.c.bf16 %v92_v13, %v91_v11  ;;  %v110_v19 = vld [vmem:[%s5524_s1 + $0xa8] sm:$0xff] }
  0x3b   :  { %3385 = vmatprep.subr.bf16.mxu1 %v3384_v8  ;;  %v3388_v17 = vpack.c.bf16 %v124_v15, %v123_v14  ;;  %v93_v20 = vld [vmem:[%s5524_s1 + $0x20] sm:$0xff]  ;;  %3357 = vmatprep.subr.bf16.mxu0 %v3356_v12  ;;  %v3360_v21 = vpack.c.bf16 %v110_v19, %v109_v18  ;;  %v94_v22 = vld [vmem:[%s5524_s1 + $0x28] sm:$0xff]  ;;  %v111_v26 = vld [vmem:[%s5524_s1 + $0xb0] sm:$0xff] }
  0x3c   :  { %3387 = vmatpush3.bf16.msra.mxu1 %v3384_v8  ;;  %v125_v23 = vld [vmem:[%s5524_s1 + $0x120] sm:$0xff]  ;;  %v126_v24 = vld [vmem:[%s5524_s1 + $0x128] sm:$0xff]  ;;  %v112_v27 = vld [vmem:[%s5524_s1 + $0xb8] sm:$0xff]  ;;  %v3362_v30 = vpack.c.bf16 %v94_v22, %v93_v20 }
  0x3d   :  { %3389 = vmatprep.subr.bf16.mxu1 %v3388_v17  ;;  %v3392_v25 = vpack.c.bf16 %v126_v24, %v125_v23  ;;  %v127_v28 = vld [vmem:[%s5524_s1 + $0x130] sm:$0xff]  ;;  %v128_v29 = vld [vmem:[%s5524_s1 + $0x138] sm:$0xff]  ;;  %v3364_v31 = vpack.c.bf16 %v112_v27, %v111_v26  ;;  %v113_v35 = vld [vmem:[%s5524_s1 + $0xc0] sm:$0xff]  ;;  %v4508_v26 = vmov 0.0  }
  0x3e   :  { %3359 = vmatpush3.bf16.msra.mxu0 %v3358_v16  ;;  %v95_v32 = vld [vmem:[%s5524_s1 + $0x30] sm:$0xff]  ;;  %v96_v33 = vld [vmem:[%s5524_s1 + $0x38] sm:$0xff]  ;;  %v3396_v34 = vpack.c.bf16 %v128_v29, %v127_v28  ;;  %v114_v36 = vld [vmem:[%s5524_s1 + $0xc8] sm:$0xff] }
  0x3f   :  { %3361 = vmatprep.subr.bf16.mxu0 %v3360_v21  ;;  %v129_v37 = vld [vmem:[%s5524_s1 + $0x140] sm:$0xff]  ;;  %v130_v38 = vld [vmem:[%s5524_s1 + $0x148] sm:$0xff]  ;;  %v3366_v39 = vpack.c.bf16 %v96_v33, %v95_v32  ;;  %v3368_v40 = vpack.c.bf16 %v114_v36, %v113_v35  ;;  %v115_v44 = vld [vmem:[%s5524_s1 + $0xd0] sm:$0xff] }
  0x40   :  { %3391 = vmatpush3.bf16.msra.mxu1 %v3388_v17  ;;  %v97_v41 = vld [vmem:[%s5524_s1 + $0x40] sm:$0xff]  ;;  %v98_v42 = vld [vmem:[%s5524_s1 + $0x48] sm:$0xff]  ;;  %v3400_v43 = vpack.c.bf16 %v130_v38, %v129_v37  ;;  %v116_v45 = vld [vmem:[%s5524_s1 + $0xd8] sm:$0xff] }
  0x41   :  { %3393 = vmatprep.subr.bf16.mxu1 %v3392_v25  ;;  %v131_v46 = vld [vmem:[%s5524_s1 + $0x150] sm:$0xff]  ;;  %v132_v47 = vld [vmem:[%s5524_s1 + $0x158] sm:$0xff]  ;;  %v84_v48 = vld [vmem:[%s5523_s0 + $0x8] sm:$0xff]  ;;  %v3370_v49 = vpack.c.bf16 %v98_v42, %v97_v41  ;;  %v3372_v51 = vpack.c.bf16 %v116_v45, %v115_v44 }
  0x42   :  { %3363 = vmatpush3.bf16.msra.mxu0 %v3362_v30  ;;  %208 = vmatprep.mubr.f32.mxu0 %v84_v48  ;;  %v85_v50 = vld [vmem:[%s5523_s0 + $0x10] sm:$0xff]  ;;  %v100_v53 = vld [vmem:[%s5524_s1 + $0x58] sm:$0xff]  ;;  %v3404_v54 = vpack.c.bf16 %v132_v47, %v131_v46  ;;  %v117_v55 = vld [vmem:[%s5524_s1 + $0xe0] sm:$0xff] }
  0x43   :  { %3365 = vmatprep.subr.bf16.mxu0 %v3364_v31  ;;  %v99_v52 = vld [vmem:[%s5524_s1 + $0x50] sm:$0xff]  ;;  %v118_v56 = vld [vmem:[%s5524_s1 + $0xe8] sm:$0xff]  ;;  %3279 = vmatprep.mubr.f32.mxu1 %v85_v50  ;;  %v133_v57 = vld [vmem:[%s5524_s1 + $0x160] sm:$0xff] }
  0x44   :  { %3395 = vmatpush3.bf16.msra.mxu1 %v3392_v25  ;;  %v134_v58 = vld [vmem:[%s5524_s1 + $0x168] sm:$0xff]  ;;  %v3374_v59 = vpack.c.bf16 %v100_v53, %v99_v52  ;;  %v3376_v60 = vpack.c.bf16 %v118_v56, %v117_v55  ;;  %v101_v61 = vld [vmem:[%s5524_s1 + $0x60] sm:$0xff]  ;;  %v119_v0 = vld [vmem:[%s5524_s1 + $0xf0] sm:$0xff] }
  0x45   :  { %3397 = vmatprep.subr.bf16.mxu1 %v3396_v34  ;;  %v102_v62 = vld [vmem:[%s5524_s1 + $0x68] sm:$0xff]  ;;  %v3408_v63 = vpack.c.bf16 %v134_v58, %v133_v57  ;;  %v120_v1 = vld [vmem:[%s5524_s1 + $0xf8] sm:$0xff]  ;;  %v135_v2 = vld [vmem:[%s5524_s1 + $0x170] sm:$0xff] }
  0x46   :  { %3367 = vmatpush3.bf16.msra.mxu0 %v3366_v39  ;;  %v136_v3 = vld [vmem:[%s5524_s1 + $0x178] sm:$0xff]  ;;  %v3378_v4 = vpack.c.bf16 %v102_v62, %v101_v61  ;;  %v3380_v5 = vpack.c.bf16 %v120_v1, %v119_v0  ;;  %v103_v6 = vld [vmem:[%s5524_s1 + $0x70] sm:$0xff]  ;;  %v83_v10 = vld [vmem:[%s5523_s0] sm:$0xff] }
  0x47   :  { %3369 = vmatprep.subr.bf16.mxu0 %v3368_v40  ;;  %v104_v7 = vld [vmem:[%s5524_s1 + $0x78] sm:$0xff]  ;;  %v3412_v8 = vpack.c.bf16 %v136_v3, %v135_v2  ;;  %v87_v11 = vld [vmem:[%s5523_s0 + $0x20] sm:$0xff]  ;;  %v88_v12 = vld [vmem:[%s5523_s0 + $0x28] sm:$0xff] }
  0x48   :  { %3399 = vmatpush3.bf16.msra.mxu1 %v3396_v34  ;;  %v3382_v9 = vpack.c.bf16 %v104_v7, %v103_v6  ;;  %v86_v13 = vld [vmem:[%s5523_s0 + $0x18] sm:$0xff]  ;;  %v301_v14 = vld [vmem:[#allocation6 + $0x8] sm:$0xff]  ;;  %v300_v18 = vld [vmem:[#allocation6] sm:$0xff] }
  0x49   :  { %3401 = vmatprep.subr.bf16.mxu1 %v3400_v43  ;;  %v305_v15 = vld [vmem:[#allocation6 + $0x28] sm:$0xff]  ;;  %v303_v16 = vld [vmem:[#allocation6 + $0x18] sm:$0xff]  ;;  %v304_v19 = vld [vmem:[#allocation6 + $0x20] sm:$0xff] }
  0x4a   :  { %3371 = vmatpush3.bf16.msra.mxu0 %v3370_v49  ;;  %v3416_v17 = vpack.c.bf16 %v305_v15, %v301_v14  ;;  %v307_v20 = vld [vmem:[#allocation6 + $0x38] sm:$0xff]  ;;  %v3418_v21 = vpack.c.bf16 %v304_v19, %v300_v18  ;;  %v302_v23 = vld [vmem:[#allocation6 + $0x10] sm:$0xff]  ;;  %v508_v27 = vld [vmem:[#allocation3 + $0x8] sm:$0xff] }
  0x4b   :  { %3373 = vmatprep.subr.bf16.mxu0 %v3372_v51  ;;  %v3420_v22 = vpack.c.bf16 %v307_v20, %v303_v16  ;;  %v306_v24 = vld [vmem:[#allocation6 + $0x30] sm:$0xff]  ;;  %v512_v28 = vld [vmem:[#allocation3 + $0x28] sm:$0xff]  ;;  %v510_v30 = vld [vmem:[#allocation3 + $0x18] sm:$0xff] }
  0x4c   :  { %3403 = vmatpush3.bf16.msra.mxu1 %v3400_v43  ;;  %v3422_v25 = vpack.c.bf16 %v306_v24, %v302_v23  ;;  %v3424_v29 = vpack.c.bf16 %v512_v28, %v508_v27  ;;  %v514_v31 = vld [vmem:[#allocation3 + $0x38] sm:$0xff]  ;;  %v3068_v36 = vld [vmem:[%s5525_s2] ss:$0 sm:$0xff]  ;;  %v509_v46 = vld [vmem:[#allocation3 + $0x10] sm:$0xff] }
  0x4d   :  { %3405 = vmatprep.subr.bf16.mxu1 %v3404_v54  ;;  %v3428_v32 = vpack.c.bf16 %v514_v31, %v510_v30  ;;  %v507_v42 = vld [vmem:[#allocation3] sm:$0xff]  ;;  %v513_v47 = vld [vmem:[#allocation3 + $0x30] sm:$0xff]  ;;  %v1022_v48 = vld [vmem:[#allocation8 + $0x8] sm:$0xff] }
  0x4e   :  { %3375 = vmatpush3.bf16.msra.mxu0 %v3374_v59  ;;  %v511_v43 = vld [vmem:[#allocation3 + $0x20] sm:$0xff]  ;;  %v1026_v49 = vld [vmem:[#allocation8 + $0x28] sm:$0xff]  ;;  %v1024_v50 = vld [vmem:[#allocation8 + $0x18] sm:$0xff]  ;;  %v3430_v55 = vpack.c.bf16 %v513_v47, %v509_v46 }
  0x4f   :  { %3377 = vmatprep.subr.bf16.mxu0 %v3376_v60  ;;  %v1028_v51 = vld [vmem:[#allocation8 + $0x38] sm:$0xff]  ;;  %v4796_v58 = vpack.c.bf16 %v1026_v49, %v1022_v48  ;;  %v1021_v61 = vld [vmem:[#allocation8] sm:$0xff]  ;;  %v1030_v0 = vld [vmem:[#allocation8 + $0x48] sm:$0xff] }
  0x50   :  { %3407 = vmatpush3.bf16.msra.mxu1 %v3404_v54  ;;  %v3426_v54 = vpack.c.bf16 %v511_v43, %v507_v42  ;;  %v4798_v59 = vpack.c.bf16 %v1028_v51, %v1024_v50  ;;  %v1025_v62 = vld [vmem:[#allocation8 + $0x20] sm:$0xff]  ;;  %v1034_v1 = vld [vmem:[#allocation8 + $0x68] sm:$0xff]  ;;  %v1023_v2 = vld [vmem:[#allocation8 + $0x10] sm:$0xff] }
  0x51   :  { %3409 = vmatprep.subr.bf16.mxu1 %v3408_v63  ;;  %v1027_v3 = vld [vmem:[#allocation8 + $0x30] sm:$0xff]  ;;  %v4815_v6 = vpack.c.bf16 %v1034_v1, %v1030_v0  ;;  %v1029_v7 = vld [vmem:[#allocation8 + $0x40] sm:$0xff]  ;;  %v492_v16 = vld [vmem:[%s5526_s3 + $0x8] sm:$0xff] }
  0x52   :  { %3379 = vmatpush3.bf16.msra.mxu0 %v3378_v4  ;;  %v491_v4 = vld [vmem:[%s5526_s3] sm:$0xff]  ;;  %v1031_v14 = vld [vmem:[#allocation8 + $0x50] sm:$0xff]  ;;  %v1040_v24 = vld [vmem:[#allocation8 + $0x98] sm:$0xff] }
  0x53   :  { %3381 = vmatprep.subr.bf16.mxu0 %v3380_v5  ;;  %v4813_v5 = vpack.c.bf16 %v1025_v62, %v1021_v61  ;;  %v1035_v15 = vld [vmem:[#allocation8 + $0x70] sm:$0xff]  ;;  %v1037_v18 = vld [vmem:[#allocation8 + $0x80] sm:$0xff]  ;;  %v1050_v27 = vld [vmem:[#allocation8 + $0xe8] sm:$0xff] }
  0x54   :  { %3411 = vmatpush3.bf16.msra.mxu1 %v3408_v63  ;;  %v1041_v19 = vld [vmem:[#allocation8 + $0xa0] sm:$0xff]  ;;  %v4835_v23 = vpack.c.bf16 %v1035_v15, %v1031_v14  ;;  %v1039_v28 = vld [vmem:[#allocation8 + $0x90] sm:$0xff]  ;;  %v494_v43 = vld [vmem:[%s5526_s3 + $0x18] sm:$0xff] }
  0x55   :  { %3413 = vmatprep.subr.bf16.mxu1 %v3412_v8  ;;  %v493_v30 = vld [vmem:[%s5526_s3 + $0x10] sm:$0xff]  ;;  %v4845_v31 = vpack.c.bf16 %v1041_v19, %v1037_v18  ;;  %v1057_v46 = vld [vmem:[#allocation8 + $0x120] sm:$0xff]  ;;  %v1062_v49 = vld [vmem:[#allocation8 + $0x148] sm:$0xff] }
  0x56   :  { %3383 = vmatpush3.bf16.msra.mxu0 %v3382_v9  ;;  %v1038_v9 = vld [vmem:[#allocation8 + $0x88] sm:$0xff]  ;;  %v1051_v42 = vld [vmem:[#allocation8 + $0xf0] sm:$0xff]  ;;  %v1056_v51 = vld [vmem:[#allocation8 + $0x118] sm:$0xff] }
  0x57   :  { %3421 = vmatprep.subr.bf16.mxu0 %v3420_v22  ;;  %v1046_v22 = vld [vmem:[#allocation8 + $0xc8] sm:$0xff]  ;;  %v1065_v61 = vld [vmem:[#allocation8 + $0x160] sm:$0xff]  ;;  %v1072_v19 = vld [vmem:[#allocation8 + $0x198] sm:$0xff] }
  0x58   :  { %3415 = vmatpush3.bf16.msra.mxu1 %v3412_v8  ;;  %v1033_v8 = vld [vmem:[#allocation8 + $0x60] sm:$0xff]  ;;  %v1070_v0 = vld [vmem:[#allocation8 + $0x188] sm:$0xff] }
  0x59   :  { %209 = vmatmul.mubr.f32.vlgmr.msra.gmra.mrb[0].mxu0 %v83_v10  ;;  %3417 = vmatprep.subr.bf16.mxu1 %v3416_v17  ;;  %v4817_v10 = vpack.c.bf16 %v1027_v3, %v1023_v2  ;;  %v4828_v17 = vpack.c.bf16 %v1033_v8, %v1029_v7  ;;  %v1064_v2 = vld [vmem:[#allocation8 + $0x158] sm:$0xff]  ;;  %v1063_v7 = vld [vmem:[#allocation8 + $0x150] sm:$0xff]  ;;  %v1078_v18 = vld [vmem:[#allocation8 + $0x1c8] sm:$0xff] }
  0x5a   :  { %213 = vmatprep.mubr.f32.mxu0 %v87_v11  ;;  %3423 = vmatpush1.bf16.msra.mxu0 %v3422_v25  ;;  %v1032_v11 = vld [vmem:[#allocation8 + $0x58] sm:$0xff]  ;;  %v1067_v8 = vld [vmem:[#allocation8 + $0x170] sm:$0xff] }
  0x5b   :  { %3280 = vmatmul.mubr.f32.vlgmr.msra.gmra.mrb[0].mxu1 %v88_v12  ;;  %3429 = vmatprep.subr.bf16.mxu0 %v3428_v32  ;;  %v1036_v12 = vld [vmem:[#allocation8 + $0x78] sm:$0xff]  ;;  %v1045_v32 = vld [vmem:[#allocation8 + $0xc0] sm:$0xff] }
  0x5c   :  { %3419 = vmatpush1.bf16.msra.mxu1 %v3418_v21  ;;  %401 = vmatprep.mubr.f32.mxu1 %v4508_v26  ;;  %v4830_v20 = vpack.c.bf16 %v1036_v12, %v1032_v11  ;;  %v1044_v25 = vld [vmem:[#allocation8 + $0xb8] sm:$0xff]  ;;  %v1069_v12 = vld [vmem:[#allocation8 + $0x180] sm:$0xff] }
  0x5d   :  { %214 = vmatmul.mubr.f32.gmra.mrb[2].mxu0 %v86_v13  ;;  %3425 = vmatprep.subr.bf16.mxu1 %v3424_v29  ;;  %v1042_v13 = vld [vmem:[#allocation8 + $0xa8] sm:$0xff]  ;;  %v1043_v29 = vld [vmem:[#allocation8 + $0xb0] sm:$0xff]  ;;  %v1068_v3 = vld [vmem:[#allocation8 + $0x178] sm:$0xff] }
  0x5e   :  { %478 = vmatprep.mubr.f32.mxu0 %v4508_v26  ;;  %v4832_v21 = vpack.c.bf16 %v1042_v13, %v1038_v9  ;;  %v496_v9 = vld [vmem:[%s5526_s3 + $0x28] sm:$0xff]  ;;  %v1073_v13 = vld [vmem:[#allocation8 + $0x1a0] sm:$0xff]  ;;  %v4905_v14 = vpack.c.bf16 %v1068_v3, %v1064_v2 }
 0x12c   :  { %v3187_v33 = vpop.f32.mrb[0].mxu0 }
 0x12d   :  { %v3188_v34 = vpop.f32.mrb[1].mxu0 }
 0x12e   :  { %v3281_v35 = vpop.f32.mrb[0].mxu1  ;;  %v3189_v37 = vadd.f32 %v3188_v34, %v3187_v33  ;;  %v1049_v33 = vld [vmem:[#allocation8 + $0xe0] sm:$0xff]  ;;  %v4848_v34 = vpack.c.bf16 %v1044_v25, %v1040_v24  ;;  %v1082_v24 = vld [vmem:[#allocation8 + $0x1e8] sm:$0xff]  ;;  %v1071_v25 = vld [vmem:[#allocation8 + $0x190] sm:$0xff] }
 0x12f   :  { %v285_v38 = vpop.f32.mrb[1].mxu1 }
 0x130   :  { %v3190_v39 = vpop.f32.mrb[2].mxu0  ;;  %v211_v40 = vadd.f32 %v3189_v37, %v3068_v36  ;;  %v4854_v37 = vpack.c.bf16 %v1043_v29, %v1039_v28  ;;  %v497_v28 = vld [vmem:[%s5526_s3 + $0x30] sm:$0xff]  ;;  %v4921_v29 = vpack.c.bf16 %v1073_v13, %v1069_v12  ;;  %v310_v13 = vlaneseq }
 0x131   :  { %v3191_v41 = vpop.f32.mrb[3].mxu0 }
 0x132   :  { %v286_v44 = vadd.f32 %v285_v38, %v211_v40  ;;  %v3192_v45 = vadd.f32 %v3191_v41, %v3190_v39  ;;  %v1048_v38 = vld [vmem:[#allocation8 + $0xd8] sm:$0xff]  ;;  %v1058_v40 = vld [vmem:[#allocation8 + $0x128] sm:$0xff]  ;;  %v1047_v41 = vld [vmem:[#allocation8 + $0xd0] sm:$0xff] }
 0x133   :  { %v1052_v39 = vld [vmem:[#allocation8 + $0xf8] sm:$0xff]  ;;  %v4873_v50 = vpack.c.bf16 %v1051_v42, %v1047_v41  ;;  %v1079_v41 = vld [vmem:[#allocation8 + $0x1d0] sm:$0xff] }
 0x134   :  { %vm294_vm1 = vcmp.gt.f32.partialorder %v286_v44, 0.0  ;;  %v296_v52 = vmul.f32 0.1, %v286_v44  ;;  %v216_v53 = vadd.f32 %v3192_v45, %v3068_v36  ;;  %v1054_v36 = vld [vmem:[#allocation8 + $0x108] sm:$0xff]  ;;  %v1053_v45 = vld [vmem:[#allocation8 + $0x100] sm:$0xff]  ;;  %v4867_v47 = vpack.c.bf16 %v1052_v39, %v1048_v38  ;;  %v1080_v39 = vld [vmem:[#allocation8 + $0x1d8] sm:$0xff] }
 0x135   :  { %v4870_v48 = vpack.c.bf16 %v1058_v40, %v1054_v36  ;;  %v1081_v36 = vld [vmem:[#allocation8 + $0x1e0] sm:$0xff]  ;;  %v1084_v40 = vld [vmem:[#allocation8 + $0x1f8] sm:$0xff]  ;;  %v1083_v42 = vld [vmem:[#allocation8 + $0x1f0] sm:$0xff] }
 0x136   :  { %v298_v56 = vsel %vm294_vm1, %v286_v44, %v296_v52  ;;  %v291_v57 = vadd.f32 %v3281_v35, %v216_v53  ;;  %v4851_v35 = vpack.c.bf16 %v1050_v27, %v1046_v22  ;;  %v4864_v44 = vpack.c.bf16 %v1049_v33, %v1045_v32  ;;  %v1060_v52 = vld [vmem:[#allocation8 + $0x138] sm:$0xff]  ;;  %v1066_v53 = vld [vmem:[#allocation8 + $0x168] sm:$0xff]  ;;  %v1075_v27 = vld [vmem:[#allocation8 + $0x1b0] sm:$0xff] }
 0x137   :  { %3069 = vmatmul.mubr.msk.f32.vlgmr.msra.gmra.mrb[2].mxu1 %vm330_vm0, %v298_v56  ;;  %3071 = vmatmul.mubr.msk.f32.vlgmr.msra.gmra.mrb[4].mxu0 %vm330_vm0, %v298_v56  ;;  %v495_v56 = vld [vmem:[%s5526_s3 + $0x20] sm:$0xff]  ;;  %v4886_v62 = vpack.c.bf16 %v1060_v52, %v1056_v51  ;;  %v1076_v22 = vld [vmem:[#allocation8 + $0x1b8] sm:$0xff]  ;;  %v4928_v33 = vpack.c.bf16 %v1082_v24, %v1078_v18  ;;  %v4930_v38 = vpack.c.bf16 %v1075_v27, %v1071_v25  ;;  %v500_v52 = vld [vmem:[%s5526_s3 + $0x48] sm:$0xff]  ;;  %v311_v18 = vshrl.u32 %v310_v13, 7 }
 0x138   :  { %3427 = vmatpush1.bf16.msra.mxu1 %v3426_v54  ;;  %407 = vmatprep.mubr.f32.mxu1 %v4508_v26  ;;  %vm295_vm2 = vcmp.gt.f32.partialorder %v291_v57, 0.0  ;;  %v297_v60 = vmul.f32 0.1, %v291_v57  ;;  %v1055_v54 = vld [vmem:[#allocation8 + $0x110] sm:$0xff]  ;;  %v4924_v32 = vpack.c.bf16 %v1076_v22, %v1072_v19  ;;  %v499_v51 = vld [vmem:[%s5526_s3 + $0x40] sm:$0xff] }
 0x139   :  { %484 = vmatprep.mubr.f32.mxu0 %v4508_v26  ;;  %3431 = vmatpush1.bf16.msra.mxu0 %v3430_v55  ;;  %v1059_v55 = vld [vmem:[#allocation8 + $0x130] sm:$0xff]  ;;  %v312_v19 = vsub.s32 0, %v311_v18  ;;  %v308_v22 = vld [vmem:[%s5529_s6] sm:$0xf]  ;;  %v316_v24 = vsub.s32 1, %v311_v18 }
 0x13a   :  { %v299_v63 = vsel %vm295_vm2, %v291_v57, %v297_v60  ;;  %3433 = vmatprep.subr.bf16.mxu1 %v4796_v58  ;;  %3465 = vmatprep.subr.bf16.mxu0 %v4798_v59  ;;  %v4883_v57 = vpack.c.bf16 %v1057_v46, %v1053_v45  ;;  %v1061_v60 = vld [vmem:[#allocation8 + $0x140] sm:$0xff]  ;;  %v4892_v1 = vpack.c.bf16 %v1059_v55, %v1055_v54  ;;  %v502_v54 = vld [vmem:[%s5526_s3 + $0x58] sm:$0xff] }
 0x13b   :  { %3070 = vmatmul.mubr.msk.f32.gmra.mrb[4].mxu1 %vm330_vm0, %v299_v63  ;;  %3072 = vmatmul.mubr.msk.f32.gmra.mrb[6].mxu0 %vm330_vm0, %v299_v63  ;;  %v4889_v63 = vpack.c.bf16 %v1066_v53, %v1062_v49  ;;  %v4902_v11 = vpack.c.bf16 %v1065_v61, %v1061_v60  ;;  %v4943_v46 = vpack.c.bf16 %v1084_v40, %v1080_v39  ;;  %v501_v53 = vld [vmem:[%s5526_s3 + $0x50] sm:$0xff]  ;;  %v503_v55 = vld [vmem:[%s5526_s3 + $0x60] sm:$0xff]  ;;  %v506_v61 = vld [vmem:[%s5526_s3 + $0x78] sm:$0xff] }
 0x13c   :  { %627 = vmatprep.mubr.f32.mxu1 %v4508_v26  ;;  %788 = vmatprep.mubr.f32.mxu0 %v4508_v26  ;;  %v4947_v49 = vpack.c.bf16 %v1083_v42, %v1079_v41  ;;  %v505_v60 = vld [vmem:[%s5526_s3 + $0x70] sm:$0xff]  ;;  %v313_v25 = vrot.slane %v308_v22, %v312_v19  ;;  %v317_v27 = vrot.slane %v308_v22, %v316_v24 }
 0x13f   :  { %3073 = vmatmul.mubr.msk.f32.vlgmr.msra.gmra.mrb[6].mxu1 %vm330_vm0, %v491_v4  ;;  %3089 = vmatmul.mubr.msk.f32.vlgmr.msra.gmra.mrb[8].mxu0 %vm330_vm0, %v491_v4  ;;  %v1074_v4 = vld [vmem:[#allocation8 + $0x1a8] sm:$0xff] }
 0x140   :  { %3435 = vmatpush1.bf16.msra.mxu1 %v4813_v5  ;;  %633 = vmatprep.mubr.f32.mxu1 %v4508_v26  ;;  %v4908_v15 = vpack.c.bf16 %v1074_v4, %v1070_v0 }
 0x141   :  { %794 = vmatprep.mubr.f32.mxu0 %v4508_v26  ;;  %3437 = vmatprep.subr.bf16.mxu1 %v4815_v6 }
 0x142   :  { %3467 = vmatpush1.bf16.msra.mxu0 %v4817_v10 }
 0x143   :  { %3074 = vmatmul.mubr.msk.f32.gmra.mrb[8].mxu1 %vm330_vm0, %v492_v16  ;;  %3090 = vmatmul.mubr.msk.f32.gmra.mrb[10].mxu0 %vm330_vm0, %v492_v16  ;;  %v4911_v16 = vpack.c.bf16 %v1067_v8, %v1063_v7 }
 0x144   :  { %639 = vmatprep.mubr.f32.mxu1 %v4508_v26  ;;  %800 = vmatprep.mubr.f32.mxu0 %v4508_v26 }
 0x145   :  { %3439 = vmatpush1.bf16.msra.mxu1 %v4828_v17  ;;  %3469 = vmatprep.subr.bf16.mxu0 %v4830_v20 }
 0x146   :  { %3441 = vmatprep.subr.bf16.mxu1 %v4832_v21  ;;  %3471 = vmatpush1.bf16.msra.mxu0 %v4835_v23 }
 0x147   :  { %3075 = vmatmul.mubr.msk.f32.gmra.mrb[10].mxu1 %vm330_vm0, %v493_v30  ;;  %3091 = vmatmul.mubr.msk.f32.gmra.mrb[12].mxu0 %vm330_vm0, %v493_v30  ;;  %v1077_v30 = vld [vmem:[#allocation8 + $0x1c0] sm:$0xff] }
 0x148   :  { %645 = vmatprep.mubr.f32.mxu1 %v4508_v26  ;;  %806 = vmatprep.mubr.f32.mxu0 %v4508_v26  ;;  %v4940_v45 = vpack.c.bf16 %v1081_v36, %v1077_v30  ;;  %v320_v30 = vsub.s32 2, %v311_v18 }
 0x149   :  { %3443 = vmatpush1.bf16.msra.mxu1 %v4845_v31  ;;  %3473 = vmatprep.subr.bf16.mxu0 %v4848_v34 }
 0x14a   :  { %3445 = vmatprep.subr.bf16.mxu1 %v4851_v35  ;;  %3475 = vmatpush1.bf16.msra.mxu0 %v4854_v37 }
 0x14b   :  { %3076 = vmatmul.mubr.msk.f32.gmra.mrb[12].mxu1 %vm330_vm0, %v494_v43  ;;  %3092 = vmatmul.mubr.msk.f32.gmra.mrb[14].mxu0 %vm330_vm0, %v494_v43  ;;  %v498_v43 = vld [vmem:[%s5526_s3 + $0x38] sm:$0xff] }
 0x14c   :  { %651 = vmatprep.mubr.f32.mxu1 %v4508_v26  ;;  %812 = vmatprep.mubr.f32.mxu0 %v4508_v26 }
 0x14d   :  { %3447 = vmatpush1.bf16.msra.mxu1 %v4864_v44  ;;  %3477 = vmatprep.subr.bf16.mxu0 %v4867_v47 }
 0x14e   :  { %3449 = vmatprep.subr.bf16.mxu1 %v4870_v48  ;;  %3479 = vmatpush1.bf16.msra.mxu0 %v4873_v50 }
 0x14f   :  { %3077 = vmatmul.mubr.msk.f32.gmra.mrb[14].mxu1 %vm330_vm0, %v495_v56  ;;  %3093 = vmatmul.mubr.msk.f32.gmra.mrb[16].mxu0 %vm330_vm0, %v495_v56  ;;  %v504_v56 = vld [vmem:[%s5526_s3 + $0x68] sm:$0xff] }
 0x150   :  { %657 = vmatprep.mubr.f32.mxu1 %v4508_v26  ;;  %818 = vmatprep.mubr.f32.mxu0 %v4508_v26 }
 0x151   :  { %3451 = vmatpush1.bf16.msra.mxu1 %v4883_v57  ;;  %3481 = vmatprep.subr.bf16.mxu0 %v4886_v62 }
 0x152   :  { %3453 = vmatprep.subr.bf16.mxu1 %v4889_v63  ;;  %3483 = vmatpush1.bf16.msra.mxu0 %v4892_v1 }
 0x153   :  { %3078 = vmatmul.mubr.msk.f32.gmra.mrb[16].mxu1 %vm330_vm0, %v496_v9  ;;  %3094 = vmatmul.mubr.msk.f32.gmra.mrb[18].mxu0 %vm330_vm0, %v496_v9 }
 0x154   :  { %663 = vmatprep.mubr.f32.mxu1 %v4508_v26  ;;  %824 = vmatprep.mubr.f32.mxu0 %v4508_v26 }
 0x155   :  { %3455 = vmatpush1.bf16.msra.mxu1 %v4902_v11  ;;  %3485 = vmatprep.subr.bf16.mxu0 %v4905_v14 }
 0x156   :  { %3457 = vmatprep.subr.bf16.mxu1 %v4908_v15  ;;  %3487 = vmatpush1.bf16.msra.mxu0 %v4911_v16 }
 0x157   :  { %3079 = vmatmul.mubr.msk.f32.gmra.mrb[18].mxu1 %vm330_vm0, %v497_v28  ;;  %3095 = vmatmul.mubr.msk.f32.gmra.mrb[20].mxu0 %vm330_vm0, %v497_v28 }
 0x158   :  { %669 = vmatprep.mubr.f32.mxu1 %v4508_v26  ;;  %830 = vmatprep.mubr.f32.mxu0 %v4508_v26 }
 0x159   :  { %3459 = vmatpush1.bf16.msra.mxu1 %v4921_v29  ;;  %3489 = vmatprep.subr.bf16.mxu0 %v4924_v32 }
 0x15a   :  { %3461 = vmatprep.subr.bf16.mxu1 %v4928_v33  ;;  %3491 = vmatpush1.bf16.msra.mxu0 %v4930_v38 }
 0x15b   :  { %3080 = vmatmul.mubr.msk.f32.gmra.mrb[20].mxu1 %vm330_vm0, %v498_v43  ;;  %3096 = vmatmul.mubr.msk.f32.gmra.mrb[22].mxu0 %vm330_vm0, %v498_v43 }
 0x15c   :  { %675 = vmatprep.mubr.f32.mxu1 %v4508_v26  ;;  %836 = vmatprep.mubr.f32.mxu0 %v4508_v26 }
 0x15d   :  { %3463 = vmatpush1.bf16.msra.mxu1 %v4940_v45  ;;  %3493 = vmatprep.subr.bf16.mxu0 %v4943_v46 }
 0x15e   :  { %3495 = vmatpush1.bf16.msra.mxu0 %v4947_v49  ;;  %3497 = vmatprep.subr.bf16.mxu1 %v4796_v58 }
 0x15f   :  { %3081 = vmatmul.mubr.msk.f32.gmra.mrb[22].mxu1 %vm330_vm0, %v499_v51  ;;  %3097 = vmatmul.mubr.msk.f32.gmra.mrb[24].mxu0 %vm330_vm0, %v499_v51  ;;  %v324_v51 = vsub.s32 3, %v311_v18 }
 0x160   :  { %681 = vmatprep.mubr.f32.mxu1 %v4508_v26  ;;  %842 = vmatprep.mubr.f32.mxu0 %v4508_v26 }
 0x161   :  { %3529 = vmatprep.subr.bf16.mxu0 %v4798_v59  ;;  %v325_v24 = vrot.slane %v308_v22, %v324_v51 }
 0x163   :  { %3082 = vmatmul.mubr.msk.f32.gmra.mrb[24].mxu1 %vm330_vm0, %v500_v52  ;;  %3098 = vmatmul.mubr.msk.f32.gmra.mrb[26].mxu0 %vm330_vm0, %v500_v52 }
 0x164   :  { %687 = vmatprep.mubr.f32.mxu1 %v4508_v26  ;;  %848 = vmatprep.mubr.f32.mxu0 %v4508_v26 }
 0x167   :  { %3083 = vmatmul.mubr.msk.f32.gmra.mrb[26].mxu1 %vm330_vm0, %v501_v53  ;;  %3099 = vmatmul.mubr.msk.f32.gmra.mrb[28].mxu0 %vm330_vm0, %v501_v53  ;;  %v321_v53 = vrot.slane %v308_v22, %v320_v30 }
 0x168   :  { %693 = vmatprep.mubr.f32.mxu1 %v4508_v26  ;;  %854 = vmatprep.mubr.f32.mxu0 %v4508_v26 }
 0x16b   :  { %3084 = vmatmul.mubr.msk.f32.gmra.mrb[28].mxu1 %vm330_vm0, %v502_v54  ;;  %3100 = vmatmul.mubr.msk.f32.gmra.mrb[30].mxu0 %vm330_vm0, %v502_v54 }
 0x16c   :  { %699 = vmatprep.mubr.f32.mxu1 %v4508_v26  ;;  %860 = vmatprep.mubr.f32.mxu0 %v4508_v26 }
 0x16f   :  { %3085 = vmatmul.mubr.msk.f32.gmra.mrb[30].mxu1 %vm330_vm0, %v503_v55  ;;  %3101 = vmatmul.mubr.msk.f32.gmra.mrb[32].mxu0 %vm330_vm0, %v503_v55 }
 0x170   :  { %705 = vmatprep.mubr.f32.mxu1 %v4508_v26  ;;  %866 = vmatprep.mubr.f32.mxu0 %v4508_v26 }
 0x173   :  { %3086 = vmatmul.mubr.msk.f32.gmra.mrb[32].mxu1 %vm330_vm0, %v504_v56  ;;  %3102 = vmatmul.mubr.msk.f32.gmra.mrb[34].mxu0 %vm330_vm0, %v504_v56 }
 0x174   :  { %711 = vmatprep.mubr.f32.mxu1 %v4508_v26  ;;  %872 = vmatprep.mubr.f32.mxu0 %v4508_v26 }
 0x177   :  { %3087 = vmatmul.mubr.msk.f32.gmra.mrb[34].mxu1 %vm330_vm0, %v505_v60  ;;  %3103 = vmatmul.mubr.msk.f32.gmra.mrb[36].mxu0 %vm330_vm0, %v505_v60 }
 0x178   :  { %717 = vmatprep.mubr.f32.mxu1 %v4508_v26  ;;  %878 = vmatprep.mubr.f32.mxu0 %v4508_v26 }
 0x17b   :  { %3088 = vmatmul.mubr.msk.f32.gmra.mrb[36].mxu1 %vm330_vm0, %v506_v61  ;;  %3104 = vmatmul.mubr.msk.f32.gmra.mrb[38].mxu0 %vm330_vm0, %v506_v61 }
 0x17c   :  { %1149 = vmatprep.mubr.f32.mxu1 %v4508_v26  ;;  %1226 = vmatprep.mubr.f32.mxu0 %v4508_v26 }
 0x17f   :  { %1150 = vmatmul.mubr.f32.vlgmr.msra.gmra.mrb[6].mxu1 %v4508_v26  ;;  %1227 = vmatmul.mubr.f32.vlgmr.msra.gmra.mrb[8].mxu0 %v4508_v26 }
 0x180   :  { %1155 = vmatprep.mubr.f32.mxu1 %v4508_v26  ;;  %1232 = vmatprep.mubr.f32.mxu0 %v4508_v26 }
 0x181   :  { %3499 = vmatpush1.bf16.msra.mxu1 %v4813_v5  ;;  %3531 = vmatpush1.bf16.msra.mxu0 %v4817_v10 }
 0x182   :  { %3501 = vmatprep.subr.bf16.mxu1 %v4815_v6  ;;  %3533 = vmatprep.subr.bf16.mxu0 %v4830_v20 }
 0x183   :  { %1156 = vmatmul.mubr.f32.gmra.mrb[8].mxu1 %v4508_v26  ;;  %1233 = vmatmul.mubr.f32.gmra.mrb[10].mxu0 %v4508_v26 }
 0x184   :  { %1368 = vmatprep.mubr.f32.mxu1 %v4508_v26  ;;  %1445 = vmatprep.mubr.f32.mxu0 %v4508_v26 }
 0x185   :  { %3503 = vmatpush1.bf16.msra.mxu1 %v4828_v17  ;;  %3535 = vmatpush1.bf16.msra.mxu0 %v4835_v23 }
 0x186   :  { %3505 = vmatprep.subr.bf16.mxu1 %v4832_v21  ;;  %3537 = vmatprep.subr.bf16.mxu0 %v4848_v34 }
 0x189   :  { %3507 = vmatpush1.bf16.msra.mxu1 %v4845_v31  ;;  %3539 = vmatpush1.bf16.msra.mxu0 %v4854_v37 }
 0x18a   :  { %3509 = vmatprep.subr.bf16.mxu1 %v4851_v35  ;;  %3541 = vmatprep.subr.bf16.mxu0 %v4867_v47 }
 0x18d   :  { %3511 = vmatpush1.bf16.msra.mxu1 %v4864_v44  ;;  %3543 = vmatpush1.bf16.msra.mxu0 %v4873_v50 }
 0x18e   :  { %3513 = vmatprep.subr.bf16.mxu1 %v4870_v48  ;;  %3545 = vmatprep.subr.bf16.mxu0 %v4886_v62 }
 0x191   :  { %3515 = vmatpush1.bf16.msra.mxu1 %v4883_v57  ;;  %3547 = vmatpush1.bf16.msra.mxu0 %v4892_v1 }
 0x192   :  { %3517 = vmatprep.subr.bf16.mxu1 %v4889_v63  ;;  %3549 = vmatprep.subr.bf16.mxu0 %v4905_v14 }
 0x195   :  { %3519 = vmatpush1.bf16.msra.mxu1 %v4902_v11  ;;  %3551 = vmatpush1.bf16.msra.mxu0 %v4911_v16 }
 0x196   :  { %3521 = vmatprep.subr.bf16.mxu1 %v4908_v15  ;;  %3553 = vmatprep.subr.bf16.mxu0 %v4924_v32 }
 0x199   :  { %3523 = vmatpush1.bf16.msra.mxu1 %v4921_v29  ;;  %3555 = vmatpush1.bf16.msra.mxu0 %v4930_v38 }
 0x19a   :  { %3525 = vmatprep.subr.bf16.mxu1 %v4928_v33  ;;  %3557 = vmatprep.subr.bf16.mxu0 %v4943_v46 }
 0x19d   :  { %3527 = vmatpush1.bf16.msra.mxu1 %v4940_v45  ;;  %3559 = vmatpush1.bf16.msra.mxu0 %v4947_v49 }
 0x19e   :  { %3561 = vmatprep.subr.bf16.mxu1 %v4796_v58  ;;  %3593 = vmatprep.subr.bf16.mxu0 %v4798_v59 }
 0x20a   :  { %v403_v0 = vpop.f32.mrb[2].mxu1  ;;  %v480_v2 = vpop.f32.mrb[4].mxu0 }
 0x20b   :  { %v405_v3 = vpop.f32.mrb[3].mxu1  ;;  %v482_v4 = vpop.f32.mrb[5].mxu0  ;;  %v5057_v28 = vadd.f32 %v403_v0, %v313_v25  ;;  %v5069_v18 = vadd.f32 %v480_v2, %v321_v53 }
 0x20c   :  { %v5059_v36 = vadd.f32 %v405_v3, %v317_v27 }
 0x20e   :  { %v409_v7 = vpop.f32.mrb[4].mxu1  ;;  %v486_v8 = vpop.f32.mrb[6].mxu0 }
 0x20f   :  { %v411_v9 = vpop.f32.mrb[5].mxu1  ;;  %v488_v12 = vpop.f32.mrb[7].mxu0  ;;  %v5063_v54 = vadd.f32 %v409_v7, %v313_v25 }
 0x210   :  { %v5065_v56 = vadd.f32 %v411_v9, %v317_v27  ;;  %v5072_v9 = vadd.f32 %v482_v4, %v325_v24  ;;  %v5074_v27 = vadd.f32 %v486_v8, %v321_v53 }
 0x252   :  { %v1151_v39 = vpop.f32.mrb[6].mxu1  ;;  %v1228_v40 = vpop.f32.mrb[8].mxu0 }
 0x253   :  { %v4008_v41 = vadd.f32 %v1151_v39, %v5057_v28  ;;  %v1153_v42 = vpop.f32.mrb[7].mxu1  ;;  %v1230_v43 = vpop.f32.mrb[9].mxu0  ;;  %v4040_v25 = vadd.f32 %v1228_v40, %v5069_v18 }
 0x254   :  { %v4009_v52 = vadd.f32 %v1153_v42, %v5059_v36  ;;  %v5077_v42 = vadd.f32 %v488_v12, %v325_v24 }
 0x255   :  { %v3105_v55 = vmul.f32 -1.442695, %v4008_v41  ;;  %v4041_v41 = vadd.f32 %v1230_v43, %v5072_v9  ;;  %v3107_v22 = vmul.f32 -1.442695, %v4040_v25 }
 0x256   :  { %v3106_v60 = vmul.f32 -1.442695, %v4009_v52  ;;  %v1157_v61 = vpop.f32.mrb[8].mxu1  ;;  %v1234_v0 = vpop.f32.mrb[10].mxu0 }
 0x257   :  { %4145 = vpow2.f32 %v3105_v55  ;;  %v4010_v3 = vadd.f32 %v1157_v61, %v5063_v54  ;;  %v1159_v13 = vpop.f32.mrb[9].mxu1  ;;  %v1236_v19 = vpop.f32.mrb[11].mxu0  ;;  %v4042_v51 = vadd.f32 %v1234_v0, %v5074_v27 }
 0x258   :  { %v4011_v39 = vadd.f32 %v1159_v13, %v5065_v56  ;;  %4147 = vpow2.f32 %v3106_v60  ;;  %v4043_v52 = vadd.f32 %v1236_v19, %v5077_v42 }
 0x259   :  { %v3108_v30 = vmul.f32 -1.442695, %v4010_v3  ;;  %v3110_v40 = vmul.f32 -1.442695, %v4042_v51 }
 0x25a   :  { %v3109_v7 = vmul.f32 -1.442695, %v4011_v39 }
 0x25b   :  { %4149 = vpow2.f32 %v3108_v30 }
 0x25c   :  { %4151 = vpow2.f32 %v3109_v7 }
 0x25d   :  { %4153 = vtanh.f32 %v4041_v41 }
 0x25e   :  { %4155 = vpow2.f32 %v3107_v22 }
 0x261   :  { %v4146_v2 = vpop.eup %4145 }
 0x262   :  { %v1265_v55 = vadd.f32 1.0, %v4146_v2  ;;  %v4148_v60 = vpop.eup %4147 }
 0x263   :  { %v1266_v4 = vadd.f32 1.0, %v4148_v60 }
 0x264   :  { %4157 = vrcp.f32 %v1265_v55 }
 0x265   :  { %v4150_v8 = vpop.eup %4149  ;;  %4159 = vtanh.f32 %v4043_v52 }
 0x266   :  { %4161 = vrcp.f32 %v1266_v4  ;;  %v1268_v53 = vadd.f32 1.0, %v4150_v8  ;;  %v4152_v43 = vpop.eup %4151 }
 0x267   :  { %4163 = vpow2.f32 %v3110_v40  ;;  %v1269_v12 = vadd.f32 1.0, %v4152_v43  ;;  %v4154_v61 = vpop.eup %4153 }
 0x268   :  { %4165 = vrcp.f32 %v1268_v53  ;;  %v4156_v0 = vpop.eup %4155 }
 0x269   :  { %4167 = vrcp.f32 %v1269_v12  ;;  %v1267_v39 = vadd.f32 1.0, %v4156_v0 }
 0x26b   :  { %4169 = vrcp.f32 %v1267_v39 }
 0x26e   :  { %v4158_v3 = vpop.eup %4157 }
 0x26f   :  { %v4160_v13 = vpop.eup %4159  ;;  %v1287_v19 = vmul.f32 %v4158_v3, %v4154_v61 }
 0x270   :  { %v4162_v24 = vpop.eup %4161 }
 0x271   :  { %v4164_v30 = vpop.eup %4163  ;;  %v1285_v7 = vmul.f32 0.0, %v4162_v24 }
 0x272   :  { %v4166_v25 = vpop.eup %4165  ;;  %v1270_v2 = vadd.f32 1.0, %v4164_v30 }
 0x273   :  { %v5081_v41 = vadd.f32 %v1287_v19, %v1285_v7  ;;  %v1288_v22 = vmul.f32 %v4166_v25, %v4160_v13  ;;  %v4168_v51 = vpop.eup %4167 }
 0x274   :  { %v1286_v52 = vmul.f32 0.0, %v4168_v51 }
 0x275   :  { %4171 = vtanh.f32 %v5081_v41  ;;  %v4170_v60 = vpop.eup %4169 }
 0x276   :  { %v5084_v55 = vadd.f32 %v1288_v22, %v1286_v52  ;;  %4173 = vrcp.f32 %v1270_v2 }
 0x278   :  { %4175 = vtanh.f32 %v5084_v55 }
 0x27f   :  { %v4172_v40 = vpop.eup %4171 }
 0x280   :  { %v1293_v4 = vmul.f32 %v4172_v40, %v4170_v60  ;;  %v4174_v8 = vpop.eup %4173 }
 0x282   :  { %1369 = vmatmul.mubr.f32.vlgmr.msra.gmra.mrb[10].mxu1 %v1293_v4  ;;  %1446 = vmatmul.mubr.f32.vlgmr.msra.gmra.mrb[12].mxu0 %v1293_v4  ;;  %v4176_v53 = vpop.eup %4175 }
 0x283   :  { %1374 = vmatprep.mubr.f32.mxu1 %v4508_v26  ;;  %1451 = vmatprep.mubr.f32.mxu0 %v4508_v26  ;;  %v1294_v43 = vmul.f32 %v4176_v53, %v4174_v8 }
 0x284   :  { %3563 = vmatpush1.bf16.msra.mxu1 %v4813_v5  ;;  %3595 = vmatpush1.bf16.msra.mxu0 %v4817_v10 }
 0x285   :  { %3565 = vmatprep.subr.bf16.mxu1 %v4815_v6  ;;  %3597 = vmatprep.subr.bf16.mxu0 %v4830_v20 }
 0x286   :  { %1375 = vmatmul.mubr.f32.gmra.mrb[12].mxu1 %v1294_v43  ;;  %1452 = vmatmul.mubr.f32.gmra.mrb[14].mxu0 %v1294_v43 }
 0x287   :  { %1587 = vmatprep.mubr.f32.mxu1 %v4508_v26  ;;  %1664 = vmatprep.mubr.f32.mxu0 %v4508_v26 }
 0x288   :  { %3567 = vmatpush1.bf16.msra.mxu1 %v4828_v17  ;;  %3599 = vmatpush1.bf16.msra.mxu0 %v4835_v23 }
 0x289   :  { %3569 = vmatprep.subr.bf16.mxu1 %v4832_v21  ;;  %3601 = vmatprep.subr.bf16.mxu0 %v4848_v34 }
 0x28c   :  { %3571 = vmatpush1.bf16.msra.mxu1 %v4845_v31  ;;  %3603 = vmatpush1.bf16.msra.mxu0 %v4854_v37 }
 0x28d   :  { %3573 = vmatprep.subr.bf16.mxu1 %v4851_v35  ;;  %3605 = vmatprep.subr.bf16.mxu0 %v4867_v47 }
 0x290   :  { %3575 = vmatpush1.bf16.msra.mxu1 %v4864_v44  ;;  %3607 = vmatpush1.bf16.msra.mxu0 %v4873_v50 }
 0x291   :  { %3577 = vmatprep.subr.bf16.mxu1 %v4870_v48  ;;  %3609 = vmatprep.subr.bf16.mxu0 %v4886_v62 }
 0x294   :  { %3579 = vmatpush1.bf16.msra.mxu1 %v4883_v57  ;;  %3611 = vmatpush1.bf16.msra.mxu0 %v4892_v1 }
 0x295   :  { %3581 = vmatprep.subr.bf16.mxu1 %v4889_v63  ;;  %3613 = vmatprep.subr.bf16.mxu0 %v4905_v14 }
 0x298   :  { %3583 = vmatpush1.bf16.msra.mxu1 %v4902_v11  ;;  %3615 = vmatpush1.bf16.msra.mxu0 %v4911_v16 }
 0x299   :  { %3585 = vmatprep.subr.bf16.mxu1 %v4908_v15  ;;  %3617 = vmatprep.subr.bf16.mxu0 %v4924_v32 }
 0x29c   :  { %3587 = vmatpush1.bf16.msra.mxu1 %v4921_v29  ;;  %3619 = vmatpush1.bf16.msra.mxu0 %v4930_v38 }
 0x29d   :  { %3589 = vmatprep.subr.bf16.mxu1 %v4928_v33  ;;  %3621 = vmatprep.subr.bf16.mxu0 %v4943_v46 }
 0x2a0   :  { %3591 = vmatpush1.bf16.msra.mxu1 %v4940_v45  ;;  %3623 = vmatpush1.bf16.msra.mxu0 %v4947_v49 }
 0x2a1   :  { %3625 = vmatprep.subr.bf16.mxu1 %v4796_v58  ;;  %3657 = vmatprep.subr.bf16.mxu0 %v4798_v59 }
 0x355   :  { %v1370_v12 = vpop.f32.mrb[10].mxu1  ;;  %v1447_v61 = vpop.f32.mrb[12].mxu0 }
 0x356   :  { %v4012_v0 = vadd.f32 %v1370_v12, %v5057_v28  ;;  %v1372_v3 = vpop.f32.mrb[11].mxu1  ;;  %v1449_v13 = vpop.f32.mrb[13].mxu0  ;;  %v4044_v40 = vadd.f32 %v1447_v61, %v5069_v18 }
 0x357   :  { %v4013_v19 = vadd.f32 %v1372_v3, %v5059_v36  ;;  %v4045_v4 = vadd.f32 %v1449_v13, %v5072_v9 }
 0x358   :  { %v3111_v24 = vmul.f32 -1.442695, %v4012_v0  ;;  %v3113_v8 = vmul.f32 -1.442695, %v4044_v40 }
 0x359   :  { %v3112_v39 = vmul.f32 -1.442695, %v4013_v19  ;;  %v1376_v30 = vpop.f32.mrb[12].mxu1  ;;  %v1453_v7 = vpop.f32.mrb[14].mxu0 }
 0x35a   :  { %4177 = vpow2.f32 %v3111_v24  ;;  %v4014_v25 = vadd.f32 %v1376_v30, %v5063_v54  ;;  %v1378_v22 = vpop.f32.mrb[13].mxu1  ;;  %v1455_v51 = vpop.f32.mrb[15].mxu0  ;;  %v4046_v53 = vadd.f32 %v1453_v7, %v5074_v27 }
 0x35b   :  { %v4015_v2 = vadd.f32 %v1378_v22, %v5065_v56  ;;  %4179 = vpow2.f32 %v3112_v39  ;;  %v4047_v12 = vadd.f32 %v1455_v51, %v5077_v42 }
 0x35c   :  { %v3114_v52 = vmul.f32 -1.442695, %v4014_v25  ;;  %v3116_v19 = vmul.f32 -1.442695, %v4046_v53 }
 0x35d   :  { %v3115_v60 = vmul.f32 -1.442695, %v4015_v2 }
 0x35e   :  { %4181 = vpow2.f32 %v3114_v52 }
 0x35f   :  { %4183 = vpow2.f32 %v3115_v60 }
 0x360   :  { %4185 = vtanh.f32 %v4045_v4 }
 0x361   :  { %4187 = vpow2.f32 %v3113_v8 }
 0x364   :  { %v4178_v43 = vpop.eup %4177 }
 0x365   :  { %v1484_v0 = vadd.f32 1.0, %v4178_v43  ;;  %v4180_v3 = vpop.eup %4179 }
 0x366   :  { %v1485_v24 = vadd.f32 1.0, %v4180_v3 }
 0x367   :  { %4189 = vrcp.f32 %v1484_v0 }
 0x368   :  { %v4182_v39 = vpop.eup %4181  ;;  %4191 = vtanh.f32 %v4047_v12 }
 0x369   :  { %4193 = vrcp.f32 %v1485_v24  ;;  %v1487_v61 = vadd.f32 1.0, %v4182_v39  ;;  %v4184_v30 = vpop.eup %4183 }
 0x36a   :  { %4195 = vpow2.f32 %v3116_v19  ;;  %v1488_v13 = vadd.f32 1.0, %v4184_v30  ;;  %v4186_v7 = vpop.eup %4185 }
 0x36b   :  { %4197 = vrcp.f32 %v1487_v61  ;;  %v4188_v25 = vpop.eup %4187 }
 0x36c   :  { %4199 = vrcp.f32 %v1488_v13  ;;  %v1486_v60 = vadd.f32 1.0, %v4188_v25 }
 0x36e   :  { %4201 = vrcp.f32 %v1486_v60 }
 0x371   :  { %v4190_v22 = vpop.eup %4189 }
 0x372   :  { %v4192_v51 = vpop.eup %4191  ;;  %v1506_v2 = vmul.f32 %v4190_v22, %v4186_v7 }
 0x373   :  { %v4194_v52 = vpop.eup %4193 }
 0x374   :  { %v4196_v40 = vpop.eup %4195  ;;  %v1504_v4 = vmul.f32 %v4194_v52, %v5081_v41 }
 0x375   :  { %v4198_v8 = vpop.eup %4197  ;;  %v1489_v0 = vadd.f32 1.0, %v4196_v40 }
 0x376   :  { %v5132_v53 = vadd.f32 %v1506_v2, %v1504_v4  ;;  %v1507_v43 = vmul.f32 %v4198_v8, %v4192_v51  ;;  %v4200_v12 = vpop.eup %4199 }
 0x377   :  { %v1505_v3 = vmul.f32 %v4200_v12, %v5084_v55 }
 0x378   :  { %4203 = vtanh.f32 %v5132_v53  ;;  %v4202_v24 = vpop.eup %4201 }
 0x379   :  { %v5136_v19 = vadd.f32 %v1507_v43, %v1505_v3  ;;  %4205 = vrcp.f32 %v1489_v0 }
 0x37b   :  { %4207 = vtanh.f32 %v5136_v19 }
 0x382   :  { %v4204_v39 = vpop.eup %4203 }
 0x383   :  { %v1512_v61 = vmul.f32 %v4204_v39, %v4202_v24  ;;  %v4206_v41 = vpop.eup %4205 }
 0x385   :  { %1588 = vmatmul.mubr.f32.vlgmr.msra.gmra.mrb[14].mxu1 %v1512_v61  ;;  %1665 = vmatmul.mubr.f32.vlgmr.msra.gmra.mrb[16].mxu0 %v1512_v61  ;;  %v4208_v30 = vpop.eup %4207 }
 0x386   :  { %1593 = vmatprep.mubr.f32.mxu1 %v4508_v26  ;;  %1670 = vmatprep.mubr.f32.mxu0 %v4508_v26  ;;  %v1513_v13 = vmul.f32 %v4208_v30, %v4206_v41 }
 0x387   :  { %3627 = vmatpush1.bf16.msra.mxu1 %v4813_v5  ;;  %3659 = vmatpush1.bf16.msra.mxu0 %v4817_v10 }
 0x388   :  { %3629 = vmatprep.subr.bf16.mxu1 %v4815_v6  ;;  %3661 = vmatprep.subr.bf16.mxu0 %v4830_v20 }
 0x389   :  { %1594 = vmatmul.mubr.f32.gmra.mrb[16].mxu1 %v1513_v13  ;;  %1671 = vmatmul.mubr.f32.gmra.mrb[18].mxu0 %v1513_v13 }
 0x38a   :  { %1806 = vmatprep.mubr.f32.mxu1 %v4508_v26  ;;  %1883 = vmatprep.mubr.f32.mxu0 %v4508_v26 }
 0x38b   :  { %3631 = vmatpush1.bf16.msra.mxu1 %v4828_v17  ;;  %3663 = vmatpush1.bf16.msra.mxu0 %v4835_v23 }
 0x38c   :  { %3633 = vmatprep.subr.bf16.mxu1 %v4832_v21  ;;  %3665 = vmatprep.subr.bf16.mxu0 %v4848_v34 }
 0x38f   :  { %3635 = vmatpush1.bf16.msra.mxu1 %v4845_v31  ;;  %3667 = vmatpush1.bf16.msra.mxu0 %v4854_v37 }
 0x390   :  { %3637 = vmatprep.subr.bf16.mxu1 %v4851_v35  ;;  %3669 = vmatprep.subr.bf16.mxu0 %v4867_v47 }
 0x393   :  { %3639 = vmatpush1.bf16.msra.mxu1 %v4864_v44  ;;  %3671 = vmatpush1.bf16.msra.mxu0 %v4873_v50 }
 0x394   :  { %3641 = vmatprep.subr.bf16.mxu1 %v4870_v48  ;;  %3673 = vmatprep.subr.bf16.mxu0 %v4886_v62 }
 0x397   :  { %3643 = vmatpush1.bf16.msra.mxu1 %v4883_v57  ;;  %3675 = vmatpush1.bf16.msra.mxu0 %v4892_v1 }
 0x398   :  { %3645 = vmatprep.subr.bf16.mxu1 %v4889_v63  ;;  %3677 = vmatprep.subr.bf16.mxu0 %v4905_v14 }
 0x39b   :  { %3647 = vmatpush1.bf16.msra.mxu1 %v4902_v11  ;;  %3679 = vmatpush1.bf16.msra.mxu0 %v4911_v16 }
 0x39c   :  { %3649 = vmatprep.subr.bf16.mxu1 %v4908_v15  ;;  %3681 = vmatprep.subr.bf16.mxu0 %v4924_v32 }
 0x39f   :  { %3651 = vmatpush1.bf16.msra.mxu1 %v4921_v29  ;;  %3683 = vmatpush1.bf16.msra.mxu0 %v4930_v38 }
 0x3a0   :  { %3653 = vmatprep.subr.bf16.mxu1 %v4928_v33  ;;  %3685 = vmatprep.subr.bf16.mxu0 %v4943_v46 }
 0x3a3   :  { %3655 = vmatpush1.bf16.msra.mxu1 %v4940_v45  ;;  %3687 = vmatpush1.bf16.msra.mxu0 %v4947_v49 }
 0x3a4   :  { %3689 = vmatprep.subr.bf16.mxu1 %v4796_v58  ;;  %3721 = vmatprep.subr.bf16.mxu0 %v4798_v59 }
 0x458   :  { %v1589_v55 = vpop.f32.mrb[14].mxu1  ;;  %v1666_v7 = vpop.f32.mrb[16].mxu0 }
 0x459   :  { %v4016_v25 = vadd.f32 %v1589_v55, %v5057_v28  ;;  %v1591_v22 = vpop.f32.mrb[15].mxu1  ;;  %v1668_v51 = vpop.f32.mrb[17].mxu0  ;;  %v4048_v39 = vadd.f32 %v1666_v7, %v5069_v18 }
 0x45a   :  { %v4017_v2 = vadd.f32 %v1591_v22, %v5059_v36  ;;  %v4049_v61 = vadd.f32 %v1668_v51, %v5072_v9 }
 0x45b   :  { %v3117_v52 = vmul.f32 -1.442695, %v4016_v25  ;;  %v3119_v41 = vmul.f32 -1.442695, %v4048_v39 }
 0x45c   :  { %v3118_v60 = vmul.f32 -1.442695, %v4017_v2  ;;  %v1595_v40 = vpop.f32.mrb[16].mxu1  ;;  %v1672_v4 = vpop.f32.mrb[18].mxu0 }
 0x45d   :  { %4209 = vpow2.f32 %v3117_v52  ;;  %v4018_v8 = vadd.f32 %v1595_v40, %v5063_v54  ;;  %v1597_v43 = vpop.f32.mrb[17].mxu1  ;;  %v1674_v12 = vpop.f32.mrb[19].mxu0  ;;  %v4050_v30 = vadd.f32 %v1672_v4, %v5074_v27 }
 0x45e   :  { %v4019_v0 = vadd.f32 %v1597_v43, %v5065_v56  ;;  %4211 = vpow2.f32 %v3118_v60  ;;  %v4051_v55 = vadd.f32 %v1674_v12, %v5077_v42 }
 0x45f   :  { %v3120_v3 = vmul.f32 -1.442695, %v4018_v8  ;;  %v3122_v2 = vmul.f32 -1.442695, %v4050_v30 }
 0x460   :  { %v3121_v24 = vmul.f32 -1.442695, %v4019_v0 }
 0x461   :  { %4213 = vpow2.f32 %v3120_v3 }
 0x462   :  { %4215 = vpow2.f32 %v3121_v24 }
 0x463   :  { %4217 = vtanh.f32 %v4049_v61 }
 0x464   :  { %4219 = vpow2.f32 %v3119_v41 }
 0x467   :  { %v4210_v13 = vpop.eup %4209 }
 0x468   :  { %v1703_v25 = vadd.f32 1.0, %v4210_v13  ;;  %v4212_v22 = vpop.eup %4211 }
 0x469   :  { %v1704_v52 = vadd.f32 1.0, %v4212_v22 }
 0x46a   :  { %4221 = vrcp.f32 %v1703_v25 }
 0x46b   :  { %v4214_v60 = vpop.eup %4213  ;;  %4223 = vtanh.f32 %v4051_v55 }
 0x46c   :  { %4225 = vrcp.f32 %v1704_v52  ;;  %v1706_v7 = vadd.f32 1.0, %v4214_v60  ;;  %v4216_v40 = vpop.eup %4215 }
 0x46d   :  { %4227 = vpow2.f32 %v3122_v2  ;;  %v1707_v51 = vadd.f32 1.0, %v4216_v40  ;;  %v4218_v4 = vpop.eup %4217 }
 0x46e   :  { %4229 = vrcp.f32 %v1706_v7  ;;  %v4220_v8 = vpop.eup %4219 }
 0x46f   :  { %4231 = vrcp.f32 %v1707_v51  ;;  %v1705_v24 = vadd.f32 1.0, %v4220_v8 }
 0x471   :  { %4233 = vrcp.f32 %v1705_v24 }
 0x474   :  { %v4222_v43 = vpop.eup %4221 }
 0x475   :  { %v4224_v12 = vpop.eup %4223  ;;  %v1725_v0 = vmul.f32 %v4222_v43, %v4218_v4 }
 0x476   :  { %v4226_v3 = vpop.eup %4225 }
 0x477   :  { %v4228_v39 = vpop.eup %4227  ;;  %v1723_v61 = vmul.f32 %v4226_v3, %v5132_v53 }
 0x478   :  { %v4230_v41 = vpop.eup %4229  ;;  %v1708_v25 = vadd.f32 1.0, %v4228_v39 }
 0x479   :  { %v5184_v30 = vadd.f32 %v1725_v0, %v1723_v61  ;;  %v1726_v13 = vmul.f32 %v4230_v41, %v4224_v12  ;;  %v4232_v55 = vpop.eup %4231 }
 0x47a   :  { %v1724_v22 = vmul.f32 %v4232_v55, %v5136_v19 }
 0x47b   :  { %4235 = vtanh.f32 %v5184_v30  ;;  %v4234_v52 = vpop.eup %4233 }
 0x47c   :  { %v5188_v2 = vadd.f32 %v1726_v13, %v1724_v22  ;;  %4237 = vrcp.f32 %v1708_v25 }
 0x47e   :  { %4239 = vtanh.f32 %v5188_v2 }
 0x485   :  { %v4236_v60 = vpop.eup %4235 }
 0x486   :  { %v1731_v7 = vmul.f32 %v4236_v60, %v4234_v52  ;;  %v4238_v53 = vpop.eup %4237 }
 0x488   :  { %1807 = vmatmul.mubr.f32.vlgmr.msra.gmra.mrb[18].mxu1 %v1731_v7  ;;  %1884 = vmatmul.mubr.f32.vlgmr.msra.gmra.mrb[20].mxu0 %v1731_v7  ;;  %v4240_v40 = vpop.eup %4239 }
 0x489   :  { %1812 = vmatprep.mubr.f32.mxu1 %v4508_v26  ;;  %1889 = vmatprep.mubr.f32.mxu0 %v4508_v26  ;;  %v1732_v51 = vmul.f32 %v4240_v40, %v4238_v53 }
 0x48a   :  { %3691 = vmatpush1.bf16.msra.mxu1 %v4813_v5  ;;  %3723 = vmatpush1.bf16.msra.mxu0 %v4817_v10 }
 0x48b   :  { %3693 = vmatprep.subr.bf16.mxu1 %v4815_v6  ;;  %3725 = vmatprep.subr.bf16.mxu0 %v4830_v20 }
 0x48c   :  { %1813 = vmatmul.mubr.f32.gmra.mrb[20].mxu1 %v1732_v51  ;;  %1890 = vmatmul.mubr.f32.gmra.mrb[22].mxu0 %v1732_v51 }
 0x48d   :  { %2025 = vmatprep.mubr.f32.mxu1 %v4508_v26  ;;  %2102 = vmatprep.mubr.f32.mxu0 %v4508_v26 }
 0x48e   :  { %3695 = vmatpush1.bf16.msra.mxu1 %v4828_v17  ;;  %3727 = vmatpush1.bf16.msra.mxu0 %v4835_v23 }
 0x48f   :  { %3697 = vmatprep.subr.bf16.mxu1 %v4832_v21  ;;  %3729 = vmatprep.subr.bf16.mxu0 %v4848_v34 }
 0x492   :  { %3699 = vmatpush1.bf16.msra.mxu1 %v4845_v31  ;;  %3731 = vmatpush1.bf16.msra.mxu0 %v4854_v37 }
 0x493   :  { %3701 = vmatprep.subr.bf16.mxu1 %v4851_v35  ;;  %3733 = vmatprep.subr.bf16.mxu0 %v4867_v47 }
 0x496   :  { %3703 = vmatpush1.bf16.msra.mxu1 %v4864_v44  ;;  %3735 = vmatpush1.bf16.msra.mxu0 %v4873_v50 }
 0x497   :  { %3705 = vmatprep.subr.bf16.mxu1 %v4870_v48  ;;  %3737 = vmatprep.subr.bf16.mxu0 %v4886_v62 }
 0x49a   :  { %3707 = vmatpush1.bf16.msra.mxu1 %v4883_v57  ;;  %3739 = vmatpush1.bf16.msra.mxu0 %v4892_v1 }
 0x49b   :  { %3709 = vmatprep.subr.bf16.mxu1 %v4889_v63  ;;  %3741 = vmatprep.subr.bf16.mxu0 %v4905_v14 }
 0x49e   :  { %3711 = vmatpush1.bf16.msra.mxu1 %v4902_v11  ;;  %3743 = vmatpush1.bf16.msra.mxu0 %v4911_v16 }
 0x49f   :  { %3713 = vmatprep.subr.bf16.mxu1 %v4908_v15  ;;  %3745 = vmatprep.subr.bf16.mxu0 %v4924_v32 }
 0x4a2   :  { %3715 = vmatpush1.bf16.msra.mxu1 %v4921_v29  ;;  %3747 = vmatpush1.bf16.msra.mxu0 %v4930_v38 }
 0x4a3   :  { %3717 = vmatprep.subr.bf16.mxu1 %v4928_v33  ;;  %3749 = vmatprep.subr.bf16.mxu0 %v4943_v46 }
 0x4a6   :  { %3719 = vmatpush1.bf16.msra.mxu1 %v4940_v45  ;;  %3751 = vmatpush1.bf16.msra.mxu0 %v4947_v49 }
 0x4a7   :  { %3753 = vmatprep.subr.bf16.mxu1 %v4796_v58  ;;  %3785 = vmatprep.subr.bf16.mxu0 %v4798_v59 }
 0x55b   :  { %v1808_v19 = vpop.f32.mrb[18].mxu1  ;;  %v1885_v4 = vpop.f32.mrb[20].mxu0 }
 0x55c   :  { %v4020_v8 = vadd.f32 %v1808_v19, %v5057_v28  ;;  %v1810_v43 = vpop.f32.mrb[19].mxu1  ;;  %v1887_v12 = vpop.f32.mrb[21].mxu0  ;;  %v4052_v60 = vadd.f32 %v1885_v4, %v5069_v18 }
 0x55d   :  { %v4021_v0 = vadd.f32 %v1810_v43, %v5059_v36  ;;  %v4053_v7 = vadd.f32 %v1887_v12, %v5072_v9 }
 0x55e   :  { %v3123_v3 = vmul.f32 -1.442695, %v4020_v8  ;;  %v3125_v53 = vmul.f32 -1.442695, %v4052_v60 }
 0x55f   :  { %v3124_v24 = vmul.f32 -1.442695, %v4021_v0  ;;  %v1814_v39 = vpop.f32.mrb[20].mxu1  ;;  %v1891_v61 = vpop.f32.mrb[22].mxu0 }
 0x560   :  { %4241 = vpow2.f32 %v3123_v3  ;;  %v4022_v41 = vadd.f32 %v1814_v39, %v5063_v54  ;;  %v1816_v13 = vpop.f32.mrb[21].mxu1  ;;  %v1893_v55 = vpop.f32.mrb[23].mxu0  ;;  %v4054_v40 = vadd.f32 %v1891_v61, %v5074_v27 }
 0x561   :  { %v4023_v25 = vadd.f32 %v1816_v13, %v5065_v56  ;;  %4243 = vpow2.f32 %v3124_v24  ;;  %v4055_v19 = vadd.f32 %v1893_v55, %v5077_v42 }
 0x562   :  { %v3126_v22 = vmul.f32 -1.442695, %v4022_v41  ;;  %v3128_v0 = vmul.f32 -1.442695, %v4054_v40 }
 0x563   :  { %v3127_v52 = vmul.f32 -1.442695, %v4023_v25 }
 0x564   :  { %4245 = vpow2.f32 %v3126_v22 }
 0x565   :  { %4247 = vpow2.f32 %v3127_v52 }
 0x566   :  { %4249 = vtanh.f32 %v4053_v7 }
 0x567   :  { %4251 = vpow2.f32 %v3125_v53 }
 0x56a   :  { %v4242_v51 = vpop.eup %4241 }
 0x56b   :  { %v1922_v8 = vadd.f32 1.0, %v4242_v51  ;;  %v4244_v43 = vpop.eup %4243 }
 0x56c   :  { %v1923_v3 = vadd.f32 1.0, %v4244_v43 }
 0x56d   :  { %4253 = vrcp.f32 %v1922_v8 }
 0x56e   :  { %v4246_v24 = vpop.eup %4245  ;;  %4255 = vtanh.f32 %v4055_v19 }
 0x56f   :  { %4257 = vrcp.f32 %v1923_v3  ;;  %v1925_v4 = vadd.f32 1.0, %v4246_v24  ;;  %v4248_v39 = vpop.eup %4247 }
 0x570   :  { %4259 = vpow2.f32 %v3128_v0  ;;  %v1926_v12 = vadd.f32 1.0, %v4248_v39  ;;  %v4250_v61 = vpop.eup %4249 }
 0x571   :  { %4261 = vrcp.f32 %v1925_v4  ;;  %v4252_v41 = vpop.eup %4251 }
 0x572   :  { %4263 = vrcp.f32 %v1926_v12  ;;  %v1924_v52 = vadd.f32 1.0, %v4252_v41 }
 0x574   :  { %4265 = vrcp.f32 %v1924_v52 }
 0x577   :  { %v4254_v13 = vpop.eup %4253 }
 0x578   :  { %v4256_v55 = vpop.eup %4255  ;;  %v1944_v25 = vmul.f32 %v4254_v13, %v4250_v61 }
 0x579   :  { %v4258_v22 = vpop.eup %4257 }
 0x57a   :  { %v4260_v60 = vpop.eup %4259  ;;  %v1942_v7 = vmul.f32 %v4258_v22, %v5184_v30 }
 0x57b   :  { %v4262_v53 = vpop.eup %4261  ;;  %v1927_v8 = vadd.f32 1.0, %v4260_v60 }
 0x57c   :  { %v5236_v40 = vadd.f32 %v1944_v25, %v1942_v7  ;;  %v1945_v51 = vmul.f32 %v4262_v53, %v4256_v55  ;;  %v4264_v19 = vpop.eup %4263 }
 0x57d   :  { %v1943_v43 = vmul.f32 %v4264_v19, %v5188_v2 }
 0x57e   :  { %4267 = vtanh.f32 %v5236_v40  ;;  %v4266_v3 = vpop.eup %4265 }
 0x57f   :  { %v5240_v0 = vadd.f32 %v1945_v51, %v1943_v43  ;;  %4269 = vrcp.f32 %v1927_v8 }
 0x581   :  { %4271 = vtanh.f32 %v5240_v0 }
 0x588   :  { %v4268_v24 = vpop.eup %4267 }
 0x589   :  { %v1950_v4 = vmul.f32 %v4268_v24, %v4266_v3  ;;  %v4270_v30 = vpop.eup %4269 }
 0x58b   :  { %2026 = vmatmul.mubr.f32.vlgmr.msra.gmra.mrb[22].mxu1 %v1950_v4  ;;  %2103 = vmatmul.mubr.f32.vlgmr.msra.gmra.mrb[24].mxu0 %v1950_v4  ;;  %v4272_v39 = vpop.eup %4271 }
 0x58c   :  { %2031 = vmatprep.mubr.f32.mxu1 %v4508_v26  ;;  %2108 = vmatprep.mubr.f32.mxu0 %v4508_v26  ;;  %v1951_v12 = vmul.f32 %v4272_v39, %v4270_v30 }
 0x58d   :  { %3755 = vmatpush1.bf16.msra.mxu1 %v4813_v5  ;;  %3787 = vmatpush1.bf16.msra.mxu0 %v4817_v10 }
 0x58e   :  { %3757 = vmatprep.subr.bf16.mxu1 %v4815_v6  ;;  %3789 = vmatprep.subr.bf16.mxu0 %v4830_v20 }
 0x58f   :  { %2032 = vmatmul.mubr.f32.gmra.mrb[24].mxu1 %v1951_v12  ;;  %2109 = vmatmul.mubr.f32.gmra.mrb[26].mxu0 %v1951_v12 }
 0x590   :  { %2244 = vmatprep.mubr.f32.mxu1 %v4508_v26  ;;  %2321 = vmatprep.mubr.f32.mxu0 %v4508_v26 }
 0x591   :  { %3759 = vmatpush1.bf16.msra.mxu1 %v4828_v17  ;;  %3791 = vmatpush1.bf16.msra.mxu0 %v4835_v23 }
 0x592   :  { %3761 = vmatprep.subr.bf16.mxu1 %v4832_v21  ;;  %3793 = vmatprep.subr.bf16.mxu0 %v4848_v34 }
 0x595   :  { %3763 = vmatpush1.bf16.msra.mxu1 %v4845_v31  ;;  %3795 = vmatpush1.bf16.msra.mxu0 %v4854_v37 }
 0x596   :  { %3765 = vmatprep.subr.bf16.mxu1 %v4851_v35  ;;  %3797 = vmatprep.subr.bf16.mxu0 %v4867_v47 }
 0x599   :  { %3767 = vmatpush1.bf16.msra.mxu1 %v4864_v44  ;;  %3799 = vmatpush1.bf16.msra.mxu0 %v4873_v50 }
 0x59a   :  { %3769 = vmatprep.subr.bf16.mxu1 %v4870_v48  ;;  %3801 = vmatprep.subr.bf16.mxu0 %v4886_v62 }
 0x59d   :  { %3771 = vmatpush1.bf16.msra.mxu1 %v4883_v57  ;;  %3803 = vmatpush1.bf16.msra.mxu0 %v4892_v1 }
 0x59e   :  { %3773 = vmatprep.subr.bf16.mxu1 %v4889_v63  ;;  %3805 = vmatprep.subr.bf16.mxu0 %v4905_v14 }
 0x5a1   :  { %3775 = vmatpush1.bf16.msra.mxu1 %v4902_v11  ;;  %3807 = vmatpush1.bf16.msra.mxu0 %v4911_v16 }
 0x5a2   :  { %3777 = vmatprep.subr.bf16.mxu1 %v4908_v15  ;;  %3809 = vmatprep.subr.bf16.mxu0 %v4924_v32 }
 0x5a5   :  { %3779 = vmatpush1.bf16.msra.mxu1 %v4921_v29  ;;  %3811 = vmatpush1.bf16.msra.mxu0 %v4930_v38 }
 0x5a6   :  { %3781 = vmatprep.subr.bf16.mxu1 %v4928_v33  ;;  %3813 = vmatprep.subr.bf16.mxu0 %v4943_v46 }
 0x5a9   :  { %3783 = vmatpush1.bf16.msra.mxu1 %v4940_v45  ;;  %3815 = vmatpush1.bf16.msra.mxu0 %v4947_v49 }
 0x5aa   :  { %3817 = vmatprep.subr.bf16.mxu1 %v4796_v58  ;;  %3849 = vmatprep.subr.bf16.mxu0 %v4798_v59 }
 0x65e   :  { %v2027_v2 = vpop.f32.mrb[22].mxu1  ;;  %v2104_v61 = vpop.f32.mrb[24].mxu0 }
 0x65f   :  { %v4024_v41 = vadd.f32 %v2027_v2, %v5057_v28  ;;  %v2029_v13 = vpop.f32.mrb[23].mxu1  ;;  %v2106_v55 = vpop.f32.mrb[25].mxu0  ;;  %v4056_v24 = vadd.f32 %v2104_v61, %v5069_v18 }
 0x660   :  { %v4025_v25 = vadd.f32 %v2029_v13, %v5059_v36  ;;  %v4057_v4 = vadd.f32 %v2106_v55, %v5072_v9 }
 0x661   :  { %v3129_v22 = vmul.f32 -1.442695, %v4024_v41  ;;  %v3131_v30 = vmul.f32 -1.442695, %v4056_v24 }
 0x662   :  { %v3130_v52 = vmul.f32 -1.442695, %v4025_v25  ;;  %v2033_v60 = vpop.f32.mrb[24].mxu1  ;;  %v2110_v7 = vpop.f32.mrb[26].mxu0 }
 0x663   :  { %4273 = vpow2.f32 %v3129_v22  ;;  %v4026_v53 = vadd.f32 %v2033_v60, %v5063_v54  ;;  %v2035_v51 = vpop.f32.mrb[25].mxu1  ;;  %v2112_v19 = vpop.f32.mrb[27].mxu0  ;;  %v4058_v39 = vadd.f32 %v2110_v7, %v5074_v27 }
 0x664   :  { %v4027_v8 = vadd.f32 %v2035_v51, %v5065_v56  ;;  %4275 = vpow2.f32 %v3130_v52  ;;  %v4059_v2 = vadd.f32 %v2112_v19, %v5077_v42 }
 0x665   :  { %v3132_v43 = vmul.f32 -1.442695, %v4026_v53  ;;  %v3134_v25 = vmul.f32 -1.442695, %v4058_v39 }
 0x666   :  { %v3133_v3 = vmul.f32 -1.442695, %v4027_v8 }
 0x667   :  { %4277 = vpow2.f32 %v3132_v43 }
 0x668   :  { %4279 = vpow2.f32 %v3133_v3 }
 0x669   :  { %4281 = vtanh.f32 %v4057_v4 }
 0x66a   :  { %4283 = vpow2.f32 %v3131_v30 }
 0x66d   :  { %v4274_v12 = vpop.eup %4273 }
 0x66e   :  { %v2141_v41 = vadd.f32 1.0, %v4274_v12  ;;  %v4276_v13 = vpop.eup %4275 }
 0x66f   :  { %v2142_v22 = vadd.f32 1.0, %v4276_v13 }
 0x670   :  { %4285 = vrcp.f32 %v2141_v41 }
 0x671   :  { %v4278_v52 = vpop.eup %4277  ;;  %4287 = vtanh.f32 %v4059_v2 }
 0x672   :  { %4289 = vrcp.f32 %v2142_v22  ;;  %v2144_v61 = vadd.f32 1.0, %v4278_v52  ;;  %v4280_v60 = vpop.eup %4279 }
 0x673   :  { %4291 = vpow2.f32 %v3134_v25  ;;  %v2145_v55 = vadd.f32 1.0, %v4280_v60  ;;  %v4282_v7 = vpop.eup %4281 }
 0x674   :  { %4293 = vrcp.f32 %v2144_v61  ;;  %v4284_v53 = vpop.eup %4283 }
 0x675   :  { %4295 = vrcp.f32 %v2145_v55  ;;  %v2143_v3 = vadd.f32 1.0, %v4284_v53 }
 0x677   :  { %4297 = vrcp.f32 %v2143_v3 }
 0x67a   :  { %v4286_v51 = vpop.eup %4285 }
 0x67b   :  { %v4288_v19 = vpop.eup %4287  ;;  %v2163_v8 = vmul.f32 %v4286_v51, %v4282_v7 }
 0x67c   :  { %v4290_v43 = vpop.eup %4289 }
 0x67d   :  { %v4292_v24 = vpop.eup %4291  ;;  %v2161_v4 = vmul.f32 %v4290_v43, %v5236_v40 }
 0x67e   :  { %v4294_v30 = vpop.eup %4293  ;;  %v2146_v41 = vadd.f32 1.0, %v4292_v24 }
 0x67f   :  { %v5288_v39 = vadd.f32 %v2163_v8, %v2161_v4  ;;  %v2164_v12 = vmul.f32 %v4294_v30, %v4288_v19  ;;  %v4296_v2 = vpop.eup %4295 }
 0x680   :  { %v2162_v13 = vmul.f32 %v4296_v2, %v5240_v0 }
 0x681   :  { %4299 = vtanh.f32 %v5288_v39  ;;  %v4298_v22 = vpop.eup %4297 }
 0x682   :  { %v5292_v25 = vadd.f32 %v2164_v12, %v2162_v13  ;;  %4301 = vrcp.f32 %v2146_v41 }
 0x684   :  { %4303 = vtanh.f32 %v5292_v25 }
 0x68b   :  { %v4300_v52 = vpop.eup %4299 }
 0x68c   :  { %v2169_v61 = vmul.f32 %v4300_v52, %v4298_v22  ;;  %v4302_v40 = vpop.eup %4301 }
 0x68e   :  { %2245 = vmatmul.mubr.f32.vlgmr.msra.gmra.mrb[26].mxu1 %v2169_v61  ;;  %2322 = vmatmul.mubr.f32.vlgmr.msra.gmra.mrb[28].mxu0 %v2169_v61  ;;  %v4304_v60 = vpop.eup %4303 }
 0x68f   :  { %2250 = vmatprep.mubr.f32.mxu1 %v4508_v26  ;;  %2327 = vmatprep.mubr.f32.mxu0 %v4508_v26  ;;  %v2170_v55 = vmul.f32 %v4304_v60, %v4302_v40 }
 0x690   :  { %3819 = vmatpush1.bf16.msra.mxu1 %v4813_v5  ;;  %3851 = vmatpush1.bf16.msra.mxu0 %v4817_v10 }
 0x691   :  { %3821 = vmatprep.subr.bf16.mxu1 %v4815_v6  ;;  %3853 = vmatprep.subr.bf16.mxu0 %v4830_v20 }
 0x692   :  { %2251 = vmatmul.mubr.f32.gmra.mrb[28].mxu1 %v2170_v55  ;;  %2328 = vmatmul.mubr.f32.gmra.mrb[30].mxu0 %v2170_v55 }
 0x693   :  { %2463 = vmatprep.mubr.f32.mxu1 %v4508_v26  ;;  %2540 = vmatprep.mubr.f32.mxu0 %v4508_v26 }
 0x694   :  { %3823 = vmatpush1.bf16.msra.mxu1 %v4828_v17  ;;  %3855 = vmatpush1.bf16.msra.mxu0 %v4835_v23 }
 0x695   :  { %3825 = vmatprep.subr.bf16.mxu1 %v4832_v21  ;;  %3857 = vmatprep.subr.bf16.mxu0 %v4848_v34 }
 0x698   :  { %3827 = vmatpush1.bf16.msra.mxu1 %v4845_v31  ;;  %3859 = vmatpush1.bf16.msra.mxu0 %v4854_v37 }
 0x699   :  { %3829 = vmatprep.subr.bf16.mxu1 %v4851_v35  ;;  %3861 = vmatprep.subr.bf16.mxu0 %v4867_v47 }
 0x69c   :  { %3831 = vmatpush1.bf16.msra.mxu1 %v4864_v44  ;;  %3863 = vmatpush1.bf16.msra.mxu0 %v4873_v50 }
 0x69d   :  { %3833 = vmatprep.subr.bf16.mxu1 %v4870_v48  ;;  %3865 = vmatprep.subr.bf16.mxu0 %v4886_v62 }
 0x6a0   :  { %3835 = vmatpush1.bf16.msra.mxu1 %v4883_v57  ;;  %3867 = vmatpush1.bf16.msra.mxu0 %v4892_v1 }
 0x6a1   :  { %3837 = vmatprep.subr.bf16.mxu1 %v4889_v63  ;;  %3869 = vmatprep.subr.bf16.mxu0 %v4905_v14 }
 0x6a4   :  { %3839 = vmatpush1.bf16.msra.mxu1 %v4902_v11  ;;  %3871 = vmatpush1.bf16.msra.mxu0 %v4911_v16 }
 0x6a5   :  { %3841 = vmatprep.subr.bf16.mxu1 %v4908_v15  ;;  %3873 = vmatprep.subr.bf16.mxu0 %v4924_v32 }
 0x6a8   :  { %3843 = vmatpush1.bf16.msra.mxu1 %v4921_v29  ;;  %3875 = vmatpush1.bf16.msra.mxu0 %v4930_v38 }
 0x6a9   :  { %3845 = vmatprep.subr.bf16.mxu1 %v4928_v33  ;;  %3877 = vmatprep.subr.bf16.mxu0 %v4943_v46 }
 0x6ac   :  { %3847 = vmatpush1.bf16.msra.mxu1 %v4940_v45  ;;  %3879 = vmatpush1.bf16.msra.mxu0 %v4947_v49 }
 0x6ad   :  { %3881 = vmatprep.subr.bf16.mxu1 %v4796_v58  ;;  %3913 = vmatprep.subr.bf16.mxu0 %v4798_v59 }
 0x761   :  { %v2246_v0 = vpop.f32.mrb[26].mxu1  ;;  %v2323_v7 = vpop.f32.mrb[28].mxu0 }
 0x762   :  { %v4028_v53 = vadd.f32 %v2246_v0, %v5057_v28  ;;  %v2248_v51 = vpop.f32.mrb[27].mxu1  ;;  %v2325_v19 = vpop.f32.mrb[29].mxu0  ;;  %v4060_v13 = vadd.f32 %v2323_v7, %v5069_v18 }
 0x763   :  { %v4029_v8 = vadd.f32 %v2248_v51, %v5059_v36  ;;  %v4061_v22 = vadd.f32 %v2325_v19, %v5072_v9 }
 0x764   :  { %v3135_v43 = vmul.f32 -1.442695, %v4028_v53  ;;  %v3137_v52 = vmul.f32 -1.442695, %v4060_v13 }
 0x765   :  { %v3136_v3 = vmul.f32 -1.442695, %v4029_v8  ;;  %v2252_v24 = vpop.f32.mrb[28].mxu1  ;;  %v2329_v4 = vpop.f32.mrb[30].mxu0 }
 0x766   :  { %4305 = vpow2.f32 %v3135_v43  ;;  %v4030_v30 = vadd.f32 %v2252_v24, %v5063_v54  ;;  %v2254_v12 = vpop.f32.mrb[29].mxu1  ;;  %v2331_v2 = vpop.f32.mrb[31].mxu0  ;;  %v4062_v61 = vadd.f32 %v2329_v4, %v5074_v27 }
 0x767   :  { %v4031_v58 = vadd.f32 %v2254_v12, %v5065_v56  ;;  %4307 = vpow2.f32 %v3136_v3  ;;  %v4063_v60 = vadd.f32 %v2331_v2, %v5077_v42 }
 0x768   :  { %v3138_v59 = vmul.f32 -1.442695, %v4030_v30  ;;  %v3140_v53 = vmul.f32 -1.442695, %v4062_v61 }
 0x769   :  { %v3139_v41 = vmul.f32 -1.442695, %v4031_v58 }
 0x76a   :  { %4309 = vpow2.f32 %v3138_v59 }
 0x76b   :  { %4311 = vpow2.f32 %v3139_v41 }
 0x76c   :  { %4313 = vtanh.f32 %v4061_v22 }
 0x76d   :  { %4315 = vpow2.f32 %v3137_v52 }
 0x770   :  { %v4306_v40 = vpop.eup %4305 }
 0x771   :  { %v2360_v55 = vadd.f32 1.0, %v4306_v40  ;;  %v4308_v0 = vpop.eup %4307 }
 0x772   :  { %v2361_v51 = vadd.f32 1.0, %v4308_v0 }
 0x773   :  { %4317 = vrcp.f32 %v2360_v55 }
 0x774   :  { %v4310_v8 = vpop.eup %4309  ;;  %4319 = vtanh.f32 %v4063_v60 }
 0x775   :  { %4321 = vrcp.f32 %v2361_v51  ;;  %v2363_v7 = vadd.f32 1.0, %v4310_v8  ;;  %v4312_v43 = vpop.eup %4311 }
 0x776   :  { %4323 = vpow2.f32 %v3140_v53  ;;  %v2364_v19 = vadd.f32 1.0, %v4312_v43  ;;  %v4314_v3 = vpop.eup %4313 }
 0x777   :  { %4325 = vrcp.f32 %v2363_v7  ;;  %v4316_v24 = vpop.eup %4315 }
 0x778   :  { %4327 = vrcp.f32 %v2364_v19  ;;  %v2362_v58 = vadd.f32 1.0, %v4316_v24 }
 0x77a   :  { %4329 = vrcp.f32 %v2362_v58 }
 0x77d   :  { %v4318_v4 = vpop.eup %4317 }
 0x77e   :  { %v4320_v30 = vpop.eup %4319  ;;  %v2382_v12 = vmul.f32 %v4318_v4, %v4314_v3 }
 0x77f   :  { %v4322_v2 = vpop.eup %4321 }
 0x780   :  { %v4324_v59 = vpop.eup %4323  ;;  %v2380_v41 = vmul.f32 %v4322_v2, %v5288_v39 }
 0x781   :  { %v4326_v13 = vpop.eup %4325  ;;  %v2365_v40 = vadd.f32 1.0, %v4324_v59 }
 0x782   :  { %v5340_v22 = vadd.f32 %v2382_v12, %v2380_v41  ;;  %v2383_v52 = vmul.f32 %v4326_v13, %v4320_v30  ;;  %v4328_v61 = vpop.eup %4327 }
 0x783   :  { %v2381_v60 = vmul.f32 %v4328_v61, %v5292_v25 }
 0x784   :  { %4331 = vtanh.f32 %v5340_v22  ;;  %v4330_v0 = vpop.eup %4329 }
 0x785   :  { %v5344_v55 = vadd.f32 %v2383_v52, %v2381_v60  ;;  %4333 = vrcp.f32 %v2365_v40 }
 0x787   :  { %4335 = vtanh.f32 %v5344_v55 }
 0x78e   :  { %v4332_v53 = vpop.eup %4331 }
 0x78f   :  { %v2388_v51 = vmul.f32 %v4332_v53, %v4330_v0  ;;  %v4334_v39 = vpop.eup %4333 }
 0x791   :  { %2464 = vmatmul.mubr.f32.vlgmr.msra.gmra.mrb[30].mxu1 %v2388_v51  ;;  %2541 = vmatmul.mubr.f32.vlgmr.msra.gmra.mrb[32].mxu0 %v2388_v51  ;;  %v4336_v8 = vpop.eup %4335 }
 0x792   :  { %2469 = vmatprep.mubr.f32.mxu1 %v4508_v26  ;;  %2546 = vmatprep.mubr.f32.mxu0 %v4508_v26  ;;  %v2389_v7 = vmul.f32 %v4336_v8, %v4334_v39  ;;  %v2829_v8 = vld [vmem:[%s5531_s8 + $0x8] sm:$0xff] }
 0x793   :  { %3883 = vmatpush1.bf16.msra.mxu1 %v4813_v5  ;;  %3915 = vmatpush1.bf16.msra.mxu0 %v4817_v10 }
 0x794   :  { %3885 = vmatprep.subr.bf16.mxu1 %v4815_v6  ;;  %3917 = vmatprep.subr.bf16.mxu0 %v4830_v20 }
 0x795   :  { %2470 = vmatmul.mubr.f32.gmra.mrb[32].mxu1 %v2389_v7  ;;  %2547 = vmatmul.mubr.f32.gmra.mrb[34].mxu0 %v2389_v7 }
 0x796   :  { %2682 = vmatprep.mubr.f32.mxu1 %v4508_v26  ;;  %2759 = vmatprep.mubr.f32.mxu0 %v4508_v26 }
 0x797   :  { %3887 = vmatpush1.bf16.msra.mxu1 %v4828_v17  ;;  %3919 = vmatpush1.bf16.msra.mxu0 %v4835_v23 }
 0x798   :  { %3889 = vmatprep.subr.bf16.mxu1 %v4832_v21  ;;  %3921 = vmatprep.subr.bf16.mxu0 %v4848_v34 }
 0x79b   :  { %3891 = vmatpush1.bf16.msra.mxu1 %v4845_v31  ;;  %3923 = vmatpush1.bf16.msra.mxu0 %v4854_v37 }
 0x79c   :  { %3893 = vmatprep.subr.bf16.mxu1 %v4851_v35  ;;  %3925 = vmatprep.subr.bf16.mxu0 %v4867_v47 }
 0x79f   :  { %3895 = vmatpush1.bf16.msra.mxu1 %v4864_v44  ;;  %3927 = vmatpush1.bf16.msra.mxu0 %v4873_v50 }
 0x7a0   :  { %3897 = vmatprep.subr.bf16.mxu1 %v4870_v48  ;;  %3929 = vmatprep.subr.bf16.mxu0 %v4886_v62 }
 0x7a3   :  { %3899 = vmatpush1.bf16.msra.mxu1 %v4883_v57  ;;  %3931 = vmatpush1.bf16.msra.mxu0 %v4892_v1 }
 0x7a4   :  { %3901 = vmatprep.subr.bf16.mxu1 %v4889_v63  ;;  %3933 = vmatprep.subr.bf16.mxu0 %v4905_v14 }
 0x7a7   :  { %3903 = vmatpush1.bf16.msra.mxu1 %v4902_v11  ;;  %3935 = vmatpush1.bf16.msra.mxu0 %v4911_v16 }
 0x7a8   :  { %3905 = vmatprep.subr.bf16.mxu1 %v4908_v15  ;;  %3937 = vmatprep.subr.bf16.mxu0 %v4924_v32 }
 0x7ab   :  { %3907 = vmatpush1.bf16.msra.mxu1 %v4921_v29  ;;  %3939 = vmatpush1.bf16.msra.mxu0 %v4930_v38 }
 0x7ac   :  { %3909 = vmatprep.subr.bf16.mxu1 %v4928_v33  ;;  %3941 = vmatprep.subr.bf16.mxu0 %v4943_v46 }
 0x7af   :  { %3911 = vmatpush1.bf16.msra.mxu1 %v4940_v45  ;;  %3943 = vmatpush1.bf16.msra.mxu0 %v4947_v49 }
 0x864   :  { %v2465_v5 = vpop.f32.mrb[30].mxu1  ;;  %v2542_v6 = vpop.f32.mrb[32].mxu0 }
 0x865   :  { %v4032_v10 = vadd.f32 %v2465_v5, %v5057_v28  ;;  %v2467_v17 = vpop.f32.mrb[31].mxu1  ;;  %v2544_v20 = vpop.f32.mrb[33].mxu0  ;;  %v4064_v62 = vadd.f32 %v2542_v6, %v5069_v18  ;;  %v2830_v5 = vld [vmem:[%s5531_s8 + $0x10] sm:$0xff] }
 0x866   :  { %v4033_v21 = vadd.f32 %v2467_v17, %v5059_v36  ;;  %v4065_v63 = vadd.f32 %v2544_v20, %v5072_v9  ;;  %v2833_v17 = vld [vmem:[%s5531_s8 + $0x28] sm:$0xff] }
 0x867   :  { %v3141_v23 = vmul.f32 -1.442695, %v4032_v10  ;;  %v3143_v1 = vmul.f32 -1.442695, %v4064_v62  ;;  %v2832_v10 = vld [vmem:[%s5531_s8 + $0x20] sm:$0xff]  ;;  %v2842_v62 = vld [vmem:[%s5531_s8 + $0x70] sm:$0xff] }
 0x868   :  { %v3142_v31 = vmul.f32 -1.442695, %v4033_v21  ;;  %v2471_v34 = vpop.f32.mrb[32].mxu1  ;;  %v2548_v35 = vpop.f32.mrb[34].mxu0  ;;  %v3952_v20 = vpack.c.bf16 %v2833_v17, %v2832_v10  ;;  %v2834_v21 = vld [vmem:[%s5531_s8 + $0x30] sm:$0xff] }
 0x869   :  { %4337 = vpow2.f32 %v3141_v23  ;;  %v4034_v37 = vadd.f32 %v2471_v34, %v5063_v54  ;;  %v2473_v44 = vpop.f32.mrb[33].mxu1  ;;  %v2550_v47 = vpop.f32.mrb[35].mxu0  ;;  %v4066_v11 = vadd.f32 %v2548_v35, %v5074_v27  ;;  %v2835_v23 = vld [vmem:[%s5531_s8 + $0x38] sm:$0xff]  ;;  %v2836_v34 = vld [vmem:[%s5531_s8 + $0x40] sm:$0xff]  ;;  %v2837_v35 = vld [vmem:[%s5531_s8 + $0x48] sm:$0xff] }
 0x86a   :  { %v4035_v48 = vadd.f32 %v2473_v44, %v5065_v56  ;;  %4339 = vpow2.f32 %v3142_v31  ;;  %v4067_v15 = vadd.f32 %v2550_v47, %v5077_v42  ;;  %v3956_v31 = vpack.c.bf16 %v2835_v23, %v2834_v21  ;;  %v2838_v44 = vld [vmem:[%s5531_s8 + $0x50] sm:$0xff]  ;;  %v2839_v47 = vld [vmem:[%s5531_s8 + $0x58] sm:$0xff] }
 0x86b   :  { %v3144_v50 = vmul.f32 -1.442695, %v4034_v37  ;;  %v3146_v32 = vmul.f32 -1.442695, %v4066_v11  ;;  %v3960_v37 = vpack.c.bf16 %v2837_v35, %v2836_v34 }
 0x86c   :  { %v3145_v57 = vmul.f32 -1.442695, %v4035_v48  ;;  %v3964_v48 = vpack.c.bf16 %v2839_v47, %v2838_v44 }
 0x86d   :  { %4341 = vpow2.f32 %v3144_v50  ;;  %v2840_v50 = vld [vmem:[%s5531_s8 + $0x60] sm:$0xff] }
 0x86e   :  { %4343 = vpow2.f32 %v3145_v57  ;;  %v2841_v57 = vld [vmem:[%s5531_s8 + $0x68] sm:$0xff] }
 0x86f   :  { %4345 = vtanh.f32 %v4065_v63  ;;  %v3968_v63 = vpack.c.bf16 %v2841_v57, %v2840_v50 }
 0x870   :  { %4347 = vpow2.f32 %v3143_v1  ;;  %v2843_v1 = vld [vmem:[%s5531_s8 + $0x78] sm:$0xff] }
 0x871   :  { %v3972_v11 = vpack.c.bf16 %v2843_v1, %v2842_v62 }
 0x873   :  { %v4338_v14 = vpop.eup %4337 }
 0x874   :  { %v2579_v16 = vadd.f32 1.0, %v4338_v14  ;;  %v4340_v29 = vpop.eup %4339  ;;  %v2932_v14 = vld [vmem:[%s5533_s10] sm:$0xff] }
 0x875   :  { %v2580_v33 = vadd.f32 1.0, %v4340_v29 }
 0x876   :  { %4349 = vrcp.f32 %v2579_v16  ;;  %v2934_v16 = vld [vmem:[%s5533_s10 + $0x10] sm:$0xff] }
 0x877   :  { %v4342_v38 = vpop.eup %4341  ;;  %4351 = vtanh.f32 %v4067_v15  ;;  %v2933_v15 = vld [vmem:[%s5533_s10 + $0x8] sm:$0xff] }
 0x878   :  { %4353 = vrcp.f32 %v2580_v33  ;;  %v2582_v45 = vadd.f32 1.0, %v4342_v38  ;;  %v4344_v46 = vpop.eup %4343  ;;  %v3976_v29 = vpack.c.bf16 %v2933_v15, %v2932_v14  ;;  %v2936_v38 = vld [vmem:[%s5533_s10 + $0x20] sm:$0xff] }
 0x879   :  { %4355 = vpow2.f32 %v3146_v32  ;;  %v2583_v49 = vadd.f32 1.0, %v4344_v46  ;;  %v4346_v25 = vpop.eup %4345  ;;  %v2935_v32 = vld [vmem:[%s5533_s10 + $0x18] sm:$0xff] }
 0x87a   :  { %4357 = vrcp.f32 %v2582_v45  ;;  %v4348_v43 = vpop.eup %4347  ;;  %v3980_v33 = vpack.c.bf16 %v2935_v32, %v2934_v16  ;;  %v2937_v45 = vld [vmem:[%s5533_s10 + $0x28] sm:$0xff]  ;;  %3977 = vmatprep.subr.bf16.mxu0 %v3976_v29 }
 0x87b   :  { %4359 = vrcp.f32 %v2583_v49  ;;  %v2581_v30 = vadd.f32 1.0, %v4348_v43  ;;  %v3984_v46 = vpack.c.bf16 %v2937_v45, %v2936_v38  ;;  %v2938_v49 = vld [vmem:[%s5533_s10 + $0x30] sm:$0xff] }
 0x87d   :  { %4361 = vrcp.f32 %v2581_v30  ;;  %v2943_v30 = vld [vmem:[%s5533_s10 + $0x58] sm:$0xff] }
 0x880   :  { %v4350_v19 = vpop.eup %4349 }
 0x881   :  { %v4352_v3 = vpop.eup %4351  ;;  %v2601_v24 = vmul.f32 %v4350_v19, %v4346_v25  ;;  %v2939_v25 = vld [vmem:[%s5533_s10 + $0x38] sm:$0xff]  ;;  %v2940_v19 = vld [vmem:[%s5533_s10 + $0x40] sm:$0xff] }
 0x882   :  { %v4354_v4 = vpop.eup %4353  ;;  %v3988_v43 = vpack.c.bf16 %v2939_v25, %v2938_v49  ;;  %v2946_v49 = vld [vmem:[%s5533_s10 + $0x70] sm:$0xff]  ;;  %v2947_v25 = vld [vmem:[%s5533_s10 + $0x78] sm:$0xff] }
 0x883   :  { %v4356_v12 = vpop.eup %4355  ;;  %v2599_v2 = vmul.f32 %v4354_v4, %v5340_v22  ;;  %v2942_v4 = vld [vmem:[%s5533_s10 + $0x50] sm:$0xff] }
 0x884   :  { %v4358_v58 = vpop.eup %4357  ;;  %v2584_v52 = vadd.f32 1.0, %v4356_v12  ;;  %v3996_v12 = vpack.c.bf16 %v2943_v30, %v2942_v4 }
 0x885   :  { %v5390_v59 = vadd.f32 %v2601_v24, %v2599_v2  ;;  %v2602_v41 = vmul.f32 %v4358_v58, %v4352_v3  ;;  %v4360_v13 = vpop.eup %4359  ;;  %v2941_v3 = vld [vmem:[%s5533_s10 + $0x48] sm:$0xff] }
 0x886   :  { %v2600_v61 = vmul.f32 %v4360_v13, %v5344_v55  ;;  %v2828_v55 = vld [vmem:[%s5531_s8] sm:$0xff]  ;;  %v3992_v24 = vpack.c.bf16 %v2941_v3, %v2940_v19 }
 0x887   :  { %4363 = vtanh.f32 %v5390_v59  ;;  %v4362_v60 = vpop.eup %4361  ;;  %v3944_v7 = vpack.c.bf16 %v2829_v8, %v2828_v55  ;;  %v3153_v19 = vld [vmem:[%s5532_s9] ss:$0 sm:$0xff]  ;;  %s4509_s9 = smov [#allocation9]  }
 0x888   :  { %v5394_v40 = vadd.f32 %v2602_v41, %v2600_v61  ;;  %4365 = vrcp.f32 %v2584_v52 }
 0x889   :  { %3945 = vmatprep.subr.bf16.mxu1 %v3944_v7 }
 0x88a   :  { %4367 = vtanh.f32 %v5394_v40 }
 0x891   :  { %v4364_v0 = vpop.eup %4363 }
 0x892   :  { %v2607_v53 = vmul.f32 %v4364_v0, %v4362_v60  ;;  %v4366_v22 = vpop.eup %4365 }
 0x894   :  { %2683 = vmatmul.mubr.f32.vlgmr.msra.gmra.mrb[34].mxu1 %v2607_v53  ;;  %2760 = vmatmul.mubr.f32.vlgmr.msra.gmra.mrb[36].mxu0 %v2607_v53  ;;  %v4368_v51 = vpop.eup %4367 }
 0x895   :  { %2688 = vmatprep.mubr.f32.mxu1 %v4508_v26  ;;  %2765 = vmatprep.mubr.f32.mxu0 %v4508_v26  ;;  %v2608_v39 = vmul.f32 %v4368_v51, %v4366_v22  ;;  %v2831_v26 = vld [vmem:[%s5531_s8 + $0x18] sm:$0xff] }
 0x896   :  { %3947 = vmatpush3.bf16.msra.mxu1 %v3944_v7  ;;  %v3948_v6 = vpack.c.bf16 %v2831_v26, %v2830_v5  ;;  %3979 = vmatpush3.bf16.msra.mxu0 %v3976_v29 }
 0x897   :  { %3981 = vmatprep.subr.bf16.mxu0 %v3980_v33 }
 0x898   :  { %2689 = vmatmul.mubr.f32.gmra.mrb[36].mxu1 %v2608_v39  ;;  %2766 = vmatmul.mubr.f32.gmra.mrb[38].mxu0 %v2608_v39 }
 0x899   :  { %3949 = vmatprep.subr.bf16.mxu1 %v3948_v6 }
 0x89a   :  { %3951 = vmatpush3.bf16.msra.mxu1 %v3948_v6  ;;  %3983 = vmatpush3.bf16.msra.mxu0 %v3980_v33 }
 0x89b   :  { %3953 = vmatprep.subr.bf16.mxu1 %v3952_v20  ;;  %3985 = vmatprep.subr.bf16.mxu0 %v3984_v46 }
 0x89e   :  { %3955 = vmatpush3.bf16.msra.mxu1 %v3952_v20  ;;  %3987 = vmatpush3.bf16.msra.mxu0 %v3984_v46  ;;  %v2945_v46 = vld [vmem:[%s5533_s10 + $0x68] sm:$0xff] }
 0x89f   :  { %3957 = vmatprep.subr.bf16.mxu1 %v3956_v31  ;;  %3989 = vmatprep.subr.bf16.mxu0 %v3988_v43 }
 0x8a2   :  { %3959 = vmatpush3.bf16.msra.mxu1 %v3956_v31  ;;  %3991 = vmatpush3.bf16.msra.mxu0 %v3988_v43  ;;  %v4004_v43 = vpack.c.bf16 %v2947_v25, %v2946_v49 }
 0x8a3   :  { %3961 = vmatprep.subr.bf16.mxu1 %v3960_v37  ;;  %3993 = vmatprep.subr.bf16.mxu0 %v3992_v24 }
 0x8a6   :  { %3963 = vmatpush3.bf16.msra.mxu1 %v3960_v37  ;;  %3995 = vmatpush3.bf16.msra.mxu0 %v3992_v24 }
 0x8a7   :  { %3965 = vmatprep.subr.bf16.mxu1 %v3964_v48  ;;  %3997 = vmatprep.subr.bf16.mxu0 %v3996_v12 }
 0x8aa   :  { %3967 = vmatpush3.bf16.msra.mxu1 %v3964_v48  ;;  %3999 = vmatpush3.bf16.msra.mxu0 %v3996_v12 }
 0x8ab   :  { %3969 = vmatprep.subr.bf16.mxu1 %v3968_v63 }
 0x8ae   :  { %3971 = vmatpush3.bf16.msra.mxu1 %v3968_v63 }
 0x8af   :  { %3973 = vmatprep.subr.bf16.mxu1 %v3972_v11 }
 0x8b2   :  { %3975 = vmatpush3.bf16.msra.mxu1 %v3972_v11 }
 0x967   :  { %v2684_v2 = vpop.f32.mrb[34].mxu1  ;;  %v2761_v58 = vpop.f32.mrb[36].mxu0 }
 0x968   :  { %v4036_v41 = vadd.f32 %v2684_v2, %v5057_v28  ;;  %v2686_v13 = vpop.f32.mrb[35].mxu1  ;;  %v2763_v52 = vpop.f32.mrb[37].mxu0  ;;  %v4068_v28 = vadd.f32 %v2761_v58, %v5069_v18 }
 0x969   :  { %v4037_v61 = vadd.f32 %v2686_v13, %v5059_v36  ;;  %v4069_v36 = vadd.f32 %v2763_v52, %v5072_v9  ;;  %v3154_v13 = vld [vmem:[%s5534_s11] ss:$0 sm:$0xff]  ;;  %s3055_s11 = sshll.u32 %s4509_s9, 4  ;;  %s3056_s11 = int_to_ptr.vmem [resolvable:$true] %s3055_s11 }
 0x96a   :  { %v3147_v60 = vmul.f32 -1.442695, %v4036_v41  ;;  %v3149_v26 = vmul.f32 -1.442695, %v4068_v28  ;;  %s4475_s26 = scalar_lea.vmem %s3056_s11, 256  ;;  %p4480_p11 = scmp.lt.s32.totalorder %s3056_s11, %s3056_s11 }
 0x96b   :  { %v3148_v0 = vmul.f32 -1.442695, %v4037_v61  ;;  %v2690_v53 = vpop.f32.mrb[36].mxu1  ;;  %v2767_v22 = vpop.f32.mrb[38].mxu0  ;;  %p4476_p10 = scmp.ne.s32.totalorder %s3056_s11, %s4475_s26  ;;  %p4481_p12 = scmp.lt.s32.totalorder %s4475_s26, %s4475_s26 }
 0x96c   :  { %4369 = vpow2.f32 %v3147_v60  ;;  %v4038_v51 = vadd.f32 %v2690_v53, %v5063_v54  ;;  %v2692_v39 = vpop.f32.mrb[37].mxu1  ;;  %v2769_v55 = vpop.f32.mrb[39].mxu0  ;;  %v4070_v6 = vadd.f32 %v2767_v22, %v5074_v27 }
 0x96d   :  { %v4039_v8 = vadd.f32 %v2692_v39, %v5065_v56  ;;  %4371 = vpow2.f32 %v3148_v0  ;;  %v4071_v17 = vadd.f32 %v2769_v55, %v5077_v42  ;;  %p4482_p13 = por %p4481_p12, %p4480_p11 }
 0x96e   :  { %v3150_v7 = vmul.f32 -1.442695, %v4038_v51  ;;  %v3152_v56 = vmul.f32 -1.442695, %v4070_v6 }
 0x96f   :  { %v3151_v5 = vmul.f32 -1.442695, %v4039_v8  ;;  %p4483_p0 = pnand %p4482_p13, %p4476_p10 }
 0x970   :  { %4373 = vpow2.f32 %v3150_v7 }
 0x971   :  { %4375 = vpow2.f32 %v3151_v5 }
 0x972   :  { %4377 = vtanh.f32 %v4069_v36 }
 0x973   :  { %4379 = vpow2.f32 %v3149_v26 }
 0x976   :  { %v4370_v10 = vpop.eup %4369 }
 0x977   :  { %v2798_v54 = vadd.f32 1.0, %v4370_v10  ;;  %v4372_v20 = vpop.eup %4371 }
 0x978   :  { %v2799_v21 = vadd.f32 1.0, %v4372_v20 }
 0x979   :  { %4381 = vrcp.f32 %v2798_v54 }
 0x97a   :  { %v4374_v23 = vpop.eup %4373  ;;  %4383 = vtanh.f32 %v4071_v17 }
 0x97b   :  { %4385 = vrcp.f32 %v2799_v21  ;;  %v2801_v18 = vadd.f32 1.0, %v4374_v23  ;;  %v4376_v31 = vpop.eup %4375 }
 0x97c   :  { %4387 = vpow2.f32 %v3152_v56  ;;  %v2802_v9 = vadd.f32 1.0, %v4376_v31  ;;  %v4378_v27 = vpop.eup %4377 }
 0x97d   :  { %4389 = vrcp.f32 %v2801_v18  ;;  %v4380_v34 = vpop.eup %4379 }
 0x97e   :  { %4391 = vrcp.f32 %v2802_v9  ;;  %v2800_v47 = vadd.f32 1.0, %v4380_v34 }
 0x980   :  { %4393 = vrcp.f32 %v2800_v47 }
 0x983   :  { %v4382_v35 = vpop.eup %4381 }
 0x984   :  { %v4384_v42 = vpop.eup %4383  ;;  %v2820_v37 = vmul.f32 %v4382_v35, %v4378_v27 }
 0x985   :  { %v4386_v44 = vpop.eup %4385 }
 0x986   :  { %v4388_v48 = vpop.eup %4387  ;;  %v2818_v50 = vmul.f32 %v4386_v44, %v5390_v59  ;;  %v2944_v59 = vld [vmem:[%s5533_s10 + $0x60] sm:$0xff] }
 0x987   :  { %v4390_v57 = vpop.eup %4389  ;;  %v2803_v11 = vadd.f32 1.0, %v4388_v48 }
 0x988   :  { %v2822_v62 = vadd.f32 %v2820_v37, %v2818_v50  ;;  %v2821_v63 = vmul.f32 %v4390_v57, %v4384_v42  ;;  %v4392_v1 = vpop.eup %4391 }
 0x989   :  { %v2819_v14 = vmul.f32 %v4392_v1, %v5394_v40  ;;  %v4000_v40 = vpack.c.bf16 %v2945_v46, %v2944_v59 }
 0x98a   :  { %4395 = vtanh.f32 %v2822_v62  ;;  %v4394_v16 = vpop.eup %4393 }
 0x98b   :  { %v2823_v15 = vadd.f32 %v2821_v63, %v2819_v14  ;;  %4397 = vrcp.f32 %v2803_v11  ;;  %4001 = vmatprep.subr.bf16.mxu0 %v4000_v40 }
 0x98c   :  { %4003 = vmatpush3.bf16.msra.mxu0 %v4000_v40 }
 0x98d   :  { %4399 = vtanh.f32 %v2823_v15  ;;  %4005 = vmatprep.subr.bf16.mxu0 %v4004_v43 }
 0x990   :  { %4007 = vmatpush3.bf16.msra.mxu0 %v4004_v43 }
 0x994   :  { %v4396_v29 = vpop.eup %4395 }
 0x995   :  { %v2826_v32 = vmul.f32 %v4396_v29, %v4394_v16  ;;  %v4398_v33 = vpop.eup %4397 }
 0x997   :  { %3314 = vmatprep.mubr.f32.mxu1 %v2826_v32  ;;  %v4400_v38 = vpop.eup %4399 }
 0x998   :  { %v2827_v45 = vmul.f32 %v4400_v38, %v4398_v33 }
 0x99a   :  { %3315 = vmatmul.mubr.f32.vlgmr.msra.gmra.mrb[38].mxu1 %v2827_v45 }
 0xa6d   :  { %v3316_v3 = vpop.f32.mrb[38].mxu1 }
 0xa6e   :  { %v2923_v24 = vadd.f32 %v3316_v3, %v3153_v19  ;;  %v2917_v4 = vpop.f32.mrb[39].mxu1 }
 0xa6f   :  { %v2918_v30 = vadd.f32 %v3153_v19, %v2917_v4 }
 0xa70   :  { %v2929_v12 = vmul.f32 0.1, %v2923_v24  ;;  %vm2927_vm3 = vcmp.gt.f32.partialorder %v2923_v24, 0.0 }
 0xa71   :  { %v2928_v2 = vmul.f32 0.1, %v2918_v30  ;;  %vm2926_vm4 = vcmp.gt.f32.partialorder %v2918_v30, 0.0 }
 0xa72   :  { %v2931_v41 = vsel %vm2927_vm3, %v2923_v24, %v2929_v12 }
 0xa73   :  { %v2930_v58 = vsel %vm2926_vm4, %v2918_v30, %v2928_v2 }
 0xa74   :  { %3349 = vmatprep.mubr.f32.mxu0 %v2930_v58 }
 0xa75   :  { %3350 = vmatmul.mubr.f32.vlgmr.msra.gmra.mrb[40].mxu0 %v2931_v41 }
 0xb48   :  { %v3351_v52 = vpop.f32.mrb[40].mxu0 }
 0xb49   :  { %v3021_v61 = vpop.f32.mrb[41].mxu0  ;;  %v3027_v0 = vadd.f32 %v3351_v52, %v3154_v13 }
 0xb4a   :  { %v3022_v60 = vadd.f32 %v3154_v13, %v3021_v61 }
 0xb4c   :  { %3030 = vmax.xlane.f32.xlu0 %v3022_v60 }
 0xb50   :  { %3032 = vmax.xlane.f32.xlu0 %v3027_v0 }
 0xbd9   :  { %v3031_v53 = vpop.xlane.xlu0 %3030 }
 0xbda   :  { %v3034_v22 = vsub.f32 %v3022_v60, %v3031_v53 }
 0xbdc   :  { %v3036_v51 = vmul.f32 1.442695, %v3034_v22 }
 0xbdd   :  { %v3033_v39 = vpop.xlane.xlu0 %3032 }
 0xbde   :  { %4401 = vpow2.f32 %v3036_v51  ;;  %v3035_v55 = vsub.f32 %v3027_v0, %v3033_v39 }
 0xbe0   :  { %v3038_v8 = vmul.f32 1.442695, %v3035_v55 }
 0xbe2   :  { %4403 = vpow2.f32 %v3038_v8 }
 0xbe8   :  { %v4402_v7 = vpop.eup %4401 }
 0xbe9   :  { %3040 = vadd.xlane.f32.xlu1 %v4402_v7 }
 0xbec   :  { %v4404_v5 = vpop.eup %4403 }
 0xbed   :  { %3042 = vadd.xlane.f32.xlu1 %v4404_v5 }
 0xc76   :  { %v3041_v28 = vpop.xlane.xlu1 %3040 }
 0xc77   :  { %4405 = vrcp.f32 %v3041_v28 }
 0xc7a   :  { %v3043_v36 = vpop.xlane.xlu1 %3042 }
 0xc7b   :  { %4407 = vrcp.f32 %v3043_v36 }
 0xc81   :  { %v4406_v26 = vpop.eup %4405 }
 0xc82   :  { %v3046_v6 = vmul.f32 %v4406_v26, %v4402_v7 }
 0xc84   :  { %3048 = vst [vmem:[#allocation9] sm:$0xff] %v3046_v6 }
 0xc85   :  { %v4408_v10 = vpop.eup %4407 }
 0xc86   :  { %v3047_v17 = vmul.f32 %v4408_v10, %v4404_v5 }
 0xc88   :  { %3049 = vst [vmem:[#allocation9 + $0x8] sm:$0xff] %v3047_v17 }
 0xc89   :  { %4486 = shalt.err (!%p4483_p0)
}
 0xc8a   :  { %s4487_s2 = scalar_lea.hbm %s5535_s12, 256 }
 0xc8b   :  { %p4488_p1 = scmp.ne.s32.totalorder %s5535_s12, %s4487_s2  ;;  %p4491_p2 = scmp.lt.u32.totalorder %s4487_s2, %s5535_s12 }
 0xc8d   :  { %p4493_p3 = pnand %p4491_p2, %p4488_p1 }
 0xc8f   :  { %4496 = shalt.err (!%p4493_p3)
}
 0xc90   :  { %s4510_s13 = smov 128   ;;  %s4511_s7 = smov 8  }
 0xc91   :  { %3061 = dma.vmem_to_hbm [thread:$0]  %s3056_s11, 256, %s5535_s12, [#allocation5], %s4510_s13, %s4510_s13, %s4511_s7  }
 0xc92   :  { %4501 = dma.done.wait [#allocation5], 256  }
 0xc93   :  { %4502 = vsyncadd [#allocation5], 4294967040 }
 0xc94   :  { %3065 = vsyncpa [#allocation4], 1 }
 0xc95   :  { %3066 = vsyncpa [#allocation7], 1 }
 0xc96   :  { %3067 = vsyncpa [#allocation5], 1 }

</bundles_post_ra>
